<compile_context>
chip_gen: v7x
topology: tpu7x:2x2x1
jax: 0.10.0
libtpu: 0.0.40
codegen_flags: <defaults>
</compile_context>

<pallas_src>
import math
from functools import partial

import jax
import jax.numpy as jnp
from jax.experimental import pallas as pl
from jax.experimental.pallas import tpu as pltpu


# Row layout of the packed per-layer (8, D) vector bundle.
_LN1_G, _LN1_B, _BO, _G1, _LN2_G, _LN2_B, _B2, _G2 = range(8)


# ----------------------------- Pallas kernel --------------------------------

def _vit_stack_kernel(x_ref, vec_ref, bqkv_ref, b1_ref,
                      wqkv_ref, wo_ref, w1_ref, w2_ref,
                      o_ref, acc_ref, *, nhead):
    """Grid point (b, l): apply encoder layer l to a tile of TB batch elements.

    The activation for the batch tile stays resident in `acc_ref` (VMEM,
    flattened to (TB*S, D) f32) across all layers; only layer 0 reads x and
    only the last layer writes o.
    """
    l = pl.program_id(1)
    n_layers = pl.num_programs(1)

    TB, S, D = x_ref.shape
    M = TB * S
    dh = D // nhead
    eps = 1e-5
    f32 = jnp.float32
    bf16 = jnp.bfloat16

    @pl.when(l == 0)
    def _():
        acc_ref[...] = x_ref[...].reshape(M, D).astype(f32)

    x = acc_ref[...]                      # (M, D) f32
    vecs = vec_ref[0]                     # (8, D) f32

    def layer_norm(v, g, b):
        # single pass: var = E[x^2] - mu^2 (two concurrent reductions)
        mu = jnp.mean(v, axis=-1, keepdims=True)
        ex2 = jnp.mean(v * v, axis=-1, keepdims=True)
        var = ex2 - mu * mu
        return (v - mu) * jax.lax.rsqrt(var + eps) * g + b

    # ---------------- self-attention block (norm_first) ----------------
    hn = layer_norm(x, vecs[_LN1_G:_LN1_G + 1], vecs[_LN1_B:_LN1_B + 1])
    hn = hn.astype(bf16)                                            # (M, D)

    # fused, lane-dense QKV projection: (M, D) x (D, 3D); q-scale folded in.
    qkv = jnp.dot(hn, wqkv_ref[0], preferred_element_type=f32) + bqkv_ref[0]
    qkv3 = qkv.astype(bf16).reshape(TB, S, 3 * D)                   # (TB, S, 3D)

    # per-head attention (score / softmax / PV are intrinsically K=dh)
    ctx_parts = []
    for h in range(nhead):
        qh = qkv3[:, :, h * dh:(h + 1) * dh]                        # (TB, S, dh)
        kh = qkv3[:, :, D + h * dh:D + (h + 1) * dh]
        vh = qkv3[:, :, 2 * D + h * dh:2 * D + (h + 1) * dh]
        s = jnp.einsum('bqd,bkd->bqk', qh, kh,
                       preferred_element_type=f32)                  # (TB, S, S)
        s = s - jnp.max(s, axis=-1, keepdims=True)
        p = jnp.exp(s)
        p = p * pl.reciprocal(jnp.sum(p, axis=-1, keepdims=True), approx=True)
        ctx_parts.append(jnp.einsum('bqk,bkd->bqd', p.astype(bf16), vh,
                                    preferred_element_type=f32))    # (TB, S, dh)
    ctx = jnp.concatenate(ctx_parts, axis=-1)                       # (TB, S, D)
    ctx2d = ctx.reshape(M, D).astype(bf16)

    # single full-K output projection: (M, D) x (D, D)
    attn = jnp.dot(ctx2d, wo_ref[0], preferred_element_type=f32)
    attn = attn + vecs[_BO:_BO + 1]
    x1 = x + vecs[_G1:_G1 + 1] * attn                               # LayerScale

    # ---------------- feed-forward block (norm_first) ----------------
    hn2 = layer_norm(x1, vecs[_LN2_G:_LN2_G + 1], vecs[_LN2_B:_LN2_B + 1])
    hn2 = hn2.astype(bf16)
    f = jnp.dot(hn2, w1_ref[0], preferred_element_type=f32) + b1_ref[0]
    # exact (erf) GELU, matching torch F.gelu default
    # TODO(synk): on v5e consider the tanh approximation (EUP slot) if VALU-bound
    f = 0.5 * f * (1.0 + jax.lax.erf(f * (1.0 / math.sqrt(2.0))))
    f2 = jnp.dot(f.astype(bf16), w2_ref[0], preferred_element_type=f32)
    f2 = f2 + vecs[_B2:_B2 + 1]
    x2 = x1 + vecs[_G2:_G2 + 1] * f2

    acc_ref[...] = x2

    @pl.when(l == n_layers - 1)
    def _():
        o_ref[...] = x2.reshape(TB, S, D).astype(o_ref.dtype)


# ----------------------- host-side param preparation -------------------------

def pack_params(layer_params, nhead):
    """Stack per-layer params with a leading layer axis.  Matmul weights are
    kept in their original (lane-dense) layouts and cast to bf16; the
    1/sqrt(dh) query scale is folded into Wq / bq; the eleven small per-layer
    vectors are fused into two operands."""
    D = layer_params[0]["wqkv"].shape[0]
    dh = D // nhead
    q_scale = 1.0 / math.sqrt(dh)
    bf16 = jnp.bfloat16

    def stack(fn):
        return jnp.stack([fn(p) for p in layer_params], axis=0)

    def scaled_wqkv(p):
        w = p["wqkv"]                                     # (D, 3D)
        return jnp.concatenate([w[:, :D] * q_scale, w[:, D:]], axis=1)

    def scaled_bqkv(p):
        b = p["bqkv"]                                     # (1, 3D)
        return jnp.concatenate([b[:, :D] * q_scale, b[:, D:]], axis=1)

    def vec_bundle(p):                                    # (8, D)
        return jnp.concatenate([p["ln1_g"], p["ln1_b"], p["bo"], p["g1"],
                                p["ln2_g"], p["ln2_b"], p["b2"], p["g2"]],
                               axis=0)

    return dict(
        vecs=stack(vec_bundle),                           # (L, 8, D)  f32
        bqkv=stack(scaled_bqkv),                          # (L, 1, 3D) f32
        b1=stack(lambda p: p["b1"]),                      # (L, 1, F)  f32
        wqkv=stack(scaled_wqkv).astype(bf16),             # (L, D, 3D) bf16
        wo=stack(lambda p: p["wo"]).astype(bf16),         # (L, D, D)  bf16
        w1=stack(lambda p: p["w1"]).astype(bf16),         # (L, D, F)  bf16
        w2=stack(lambda p: p["w2"]).astype(bf16),         # (L, F, D)  bf16
    )


def _pick_batch_block(B, requested=None):
    if requested is not None:
        assert B % requested == 0, "batch_block must divide the batch size"
        return requested
    for tb in (8, 4, 2):
        if B % tb == 0:
            return tb
    return 1


def _vmem_limit_bytes():
    # ~3/4 of physical VMEM: ≈48 MiB on v7x (64 MiB/TC), ≈96 MiB on v5e/v6e.
    try:
        cap = int(pltpu.get_tpu_info().vmem_capacity_bytes)
    except Exception:
        cap = 128 * 1024 * 1024
    return int(min(cap * 3 // 4, 112 * 1024 * 1024))


def standard_vit_forward(x, layer_params, *, nhead, batch_block=None):
    """StandardViT._forward: all encoder layers fused into one pallas_call."""
    B, S, D = x.shape
    L = len(layer_params)
    F = layer_params[0]["w1"].shape[1]
    assert D % nhead == 0, "HIDDEN_SIZE must be divisible by NUM_ATTENTION_HEADS"
    TB = _pick_batch_block(B, batch_block)

    pp = pack_params(layer_params, nhead)

    def wspec(shape):
        nd = len(shape)
        return pl.BlockSpec((1,) + tuple(shape),
                            lambda b, l, _n=nd: (l,) + (0,) * _n)

    in_specs = [
        pl.BlockSpec((TB, S, D), lambda b, l: (b, 0, 0)),  # x (batch tile)
        wspec((8, D)),           # packed per-layer vectors
        wspec((1, 3 * D)),       # bqkv (q part pre-scaled)
        wspec((1, F)),           # b1
        wspec((D, 3 * D)),       # Wqkv (q cols pre-scaled)
        wspec((D, D)),           # Wo
        wspec((D, F)),           # W1
        wspec((F, D)),           # W2
    ]
    out_spec = pl.BlockSpec((TB, S, D), lambda b, l: (b, 0, 0))

    flops = 2 * B * L * S * (4 * D * D + 2 * S * D + 2 * D * F)
    transcendentals = B * L * (nhead * S * S + S * F)
    weight_bytes = sum(int(v.size) * v.dtype.itemsize for v in pp.values())
    bytes_accessed = 2 * B * S * D * x.dtype.itemsize + (B // TB) * weight_bytes

    return pl.pallas_call(
        partial(_vit_stack_kernel, nhead=nhead),
        out_shape=jax.ShapeDtypeStruct((B, S, D), x.dtype),
        grid=(B // TB, L),
        in_specs=in_specs,
        out_specs=out_spec,
        scratch_shapes=[pltpu.VMEM((TB * S, D), jnp.float32)],  # resident activation
        compiler_params=pltpu.CompilerParams(
            dimension_semantics=("parallel", "arbitrary"),
            vmem_limit_bytes=_vmem_limit_bytes()),
        cost_estimate=pl.CostEstimate(
            flops=int(flops),
            transcendentals=int(transcendentals),
            bytes_accessed=int(bytes_accessed)),
    )(x, pp["vecs"], pp["bqkv"], pp["b1"], pp["wqkv"], pp["wo"],
      pp["w1"], pp["w2"])


# ------------------------- pure-JAX reference --------------------------------

def _ref_layer(x, p, nhead):
    D = x.shape[-1]
    dh = D // nhead
    eps = 1e-5

    def ln(v, g, b):
        mu = jnp.mean(v, -1, keepdims=True)
        var = jnp.mean((v - mu) ** 2, -1, keepdims=True)
        return (v - mu) / jnp.sqrt(var + eps) * g + b

    hn = ln(x, p["ln1_g"][0], p["ln1_b"][0])
    qkv = hn @ p["wqkv"] + p["bqkv"][0]
    q, k, v = qkv[..., :D], qkv[..., D:2 * D], qkv[..., 2 * D:]
    B, S, _ = x.shape
    q = q.reshape(B, S, nhead, dh).transpose(0, 2, 1, 3) / math.sqrt(dh)
    k = k.reshape(B, S, nhead, dh).transpose(0, 2, 1, 3)
    v = v.reshape(B, S, nhead, dh).transpose(0, 2, 1, 3)
    att = jax.nn.softmax(q @ k.transpose(0, 1, 3, 2), axis=-1)
    ctx = (att @ v).transpose(0, 2, 1, 3).reshape(B, S, D)
    x1 = x + p["g1"][0] * (ctx @ p["wo"] + p["bo"][0])
    hn2 = ln(x1, p["ln2_g"][0], p["ln2_b"][0])
    f = hn2 @ p["w1"] + p["b1"][0]
    f = 0.5 * f * (1.0 + jax.lax.erf(f / math.sqrt(2.0)))
    return x1 + p["g2"][0] * (f @ p["w2"] + p["b2"][0])


# ------------------------------ params setup ---------------------------------

def make_layer_params(key, D, F, ls_init=1.0):
    ks = jax.random.split(key, 4)
    s = 0.02
    return dict(
        ln1_g=jnp.ones((1, D), jnp.float32),
        ln1_b=jnp.zeros((1, D), jnp.float32),
        wqkv=s * jax.random.normal(ks[0], (D, 3 * D), jnp.float32),
        bqkv=jnp.zeros((1, 3 * D), jnp.float32),
        wo=s * jax.random.normal(ks[1], (D, D), jnp.float32),
        bo=jnp.zeros((1, D), jnp.float32),
        g1=ls_init * jnp.ones((1, D), jnp.float32),
        ln2_g=jnp.ones((1, D), jnp.float32),
        ln2_b=jnp.zeros((1, D), jnp.float32),
        w1=s * jax.random.normal(ks[2], (D, F), jnp.float32),
        b1=jnp.zeros((1, F), jnp.float32),
        w2=s * jax.random.normal(ks[3], (F, D), jnp.float32),
        b2=jnp.zeros((1, D), jnp.float32),
        g2=ls_init * jnp.ones((1, D), jnp.float32),
    )


if __name__ == "__main__":
    # small config consistent with cfg.{HIDDEN_SIZE, NUM_ATTENTION_HEADS,
    # INTERMEDIATE_SIZE, NUM_HIDDEN_LAYERS}
    NUM_HIDDEN_LAYERS = 2
    HIDDEN_SIZE = 32
    NUM_HEADS = 4
    INTERMEDIATE_SIZE = 64
    B, S = 2, 8

    key = jax.random.PRNGKey(0)
    kx, *kls = jax.random.split(key, 1 + NUM_HIDDEN_LAYERS)
    x = jax.random.normal(kx, (B, S, HIDDEN_SIZE), jnp.float32)
    layer_params = [make_layer_params(kls[i], HIDDEN_SIZE, INTERMEDIATE_SIZE)
                    for i in range(NUM_HIDDEN_LAYERS)]

    out = standard_vit_forward(x, layer_params, nhead=NUM_HEADS)
    out = jax.block_until_ready(out)

    # sanity check against a pure-f32 JAX reference of the same math
    ref = x
    for p in layer_params:
        ref = _ref_layer(ref, p, NUM_HEADS)
    assert out.shape == (B, S, HIDDEN_SIZE)
    max_err = float(jnp.max(jnp.abs(out - ref)))
    # bf16 MXU operands + approx reciprocal => slightly looser tolerance than f32
    assert max_err < 2e-2, f"mismatch vs reference: max abs err = {max_err}"

    print("KERNEL_OK")
</pallas_src>

<mosaic_0001>
module attributes {stable_mosaic.version = 11 : i64} {
  func.func @_vit_stack_kernel(%arg0: i32, %arg1: i32, %arg2: memref<2x8x32xf32, #tpu.memory_space<vmem>>, %arg3: memref<1x8x32xf32, #tpu.memory_space<vmem>>, %arg4: memref<1x1x96xf32, #tpu.memory_space<vmem>>, %arg5: memref<1x1x64xf32, #tpu.memory_space<vmem>>, %arg6: memref<1x32x96xbf16, #tpu.memory_space<vmem>>, %arg7: memref<1x32x32xbf16, #tpu.memory_space<vmem>>, %arg8: memref<1x32x64xbf16, #tpu.memory_space<vmem>>, %arg9: memref<1x64x32xbf16, #tpu.memory_space<vmem>>, %arg10: memref<2x8x32xf32, #tpu.memory_space<vmem>>, %arg11: memref<16x32xf32, #tpu.memory_space<vmem>>) attributes {dimension_semantics = [#tpu.dimension_semantics<parallel>, #tpu.dimension_semantics<arbitrary>], iteration_bounds = array<i64: 1, 2>, scalar_prefetch = 0 : i64, scratch_operands = 1 : i64, tpu.core_type = #tpu.core_type<tc>, window_params = [{transform_indices = @transform_0, window_bounds = array<i64: 2, 8, 32>}, {transform_indices = @transform_1, window_bounds = array<i64: 1, 8, 32>}, {transform_indices = @transform_2, window_bounds = array<i64: 1, 1, 96>}, {transform_indices = @transform_3, window_bounds = array<i64: 1, 1, 64>}, {transform_indices = @transform_4, window_bounds = array<i64: 1, 32, 96>}, {transform_indices = @transform_5, window_bounds = array<i64: 1, 32, 32>}, {transform_indices = @transform_6, window_bounds = array<i64: 1, 32, 64>}, {transform_indices = @transform_7, window_bounds = array<i64: 1, 64, 32>}, {transform_indices = @transform_8, window_bounds = array<i64: 2, 8, 32>}]} {
    %c0_i32 = arith.constant 0 : i32
    %0 = arith.cmpi eq, %arg1, %c0_i32 : i32
    %1 = arith.extui %0 : i1 to i32
    %c0_i32_0 = arith.constant 0 : i32
    %2 = arith.cmpi ne, %1, %c0_i32_0 : i32
    scf.if %2 {
      %c0_58 = arith.constant 0 : index
      %c0_59 = arith.constant 0 : index
      %c0_60 = arith.constant 0 : index
      %172 = vector.load %arg2[%c0_58, %c0_59, %c0_60] : memref<2x8x32xf32, #tpu.memory_space<vmem>>, vector<2x8x32xf32>
      %173 = vector.shape_cast %172 : vector<2x8x32xf32> to vector<16x32xf32>
      %c0_61 = arith.constant 0 : index
      %c0_62 = arith.constant 0 : index
      %174 = vector.load %arg11[%c0_61, %c0_62] : memref<16x32xf32, #tpu.memory_space<vmem>>, vector<16x32xf32>
      tpu.vector_store %arg11[%c0_61, %c0_62], %173 {strides = array<i32>} : memref<16x32xf32, #tpu.memory_space<vmem>>, vector<16x32xf32>,
    } else {
    }
    %c0 = arith.constant 0 : index
    %c0_1 = arith.constant 0 : index
    %3 = vector.load %arg11[%c0, %c0_1] : memref<16x32xf32, #tpu.memory_space<vmem>>, vector<16x32xf32>
    %c0_2 = arith.constant 0 : index
    %c0_3 = arith.constant 0 : index
    %c0_4 = arith.constant 0 : index
    %4 = vector.load %arg3[%c0_2, %c0_3, %c0_4] : memref<1x8x32xf32, #tpu.memory_space<vmem>>, vector<1x8x32xf32>
    %5 = vector.shape_cast %4 : vector<1x8x32xf32> to vector<8x32xf32>
    %6 = vector.extract_strided_slice %5 {offsets = [0, 0], sizes = [1, 32], strides = [1, 1]} : vector<8x32xf32> to vector<1x32xf32>
    %7 = vector.extract_strided_slice %5 {offsets = [1, 0], sizes = [1, 32], strides = [1, 1]} : vector<8x32xf32> to vector<1x32xf32>
    %cst = arith.constant dense<0.000000e+00> : vector<16xf32>
    %8 = vector.multi_reduction <add>, %3, %cst [1] : vector<16x32xf32> to vector<16xf32>
    %9 = vector.shape_cast %8 : vector<16xf32> to vector<16x1xf32>
    %cst_5 = arith.constant 3.200000e+01 : f32
    %10 = vector.broadcast %cst_5 : f32 to vector<16x1xf32>
    %11 = arith.divf %9, %10 : vector<16x1xf32>
    %12 = arith.mulf %3, %3 : vector<16x32xf32>
    %cst_6 = arith.constant dense<0.000000e+00> : vector<16xf32>
    %13 = vector.multi_reduction <add>, %12, %cst_6 [1] : vector<16x32xf32> to vector<16xf32>
    %14 = vector.shape_cast %13 : vector<16xf32> to vector<16x1xf32>
    %cst_7 = arith.constant 3.200000e+01 : f32
    %15 = vector.broadcast %cst_7 : f32 to vector<16x1xf32>
    %16 = arith.divf %14, %15 : vector<16x1xf32>
    %17 = arith.mulf %11, %11 : vector<16x1xf32>
    %18 = arith.subf %16, %17 : vector<16x1xf32>
    %19 = vector.broadcast %11 : vector<16x1xf32> to vector<16x32xf32>
    %20 = arith.subf %3, %19 : vector<16x32xf32>
    %cst_8 = arith.constant 9.99999974E-6 : f32
    %21 = vector.broadcast %cst_8 : f32 to vector<16x1xf32>
    %22 = arith.addf %18, %21 : vector<16x1xf32>
    %23 = math.rsqrt %22 : vector<16x1xf32>
    %24 = vector.broadcast %23 : vector<16x1xf32> to vector<16x32xf32>
    %25 = arith.mulf %20, %24 : vector<16x32xf32>
    %26 = vector.broadcast %6 : vector<1x32xf32> to vector<16x32xf32>
    %27 = arith.mulf %25, %26 : vector<16x32xf32>
    %28 = vector.broadcast %7 : vector<1x32xf32> to vector<16x32xf32>
    %29 = arith.addf %27, %28 : vector<16x32xf32>
    %30 = arith.truncf %29 : vector<16x32xf32> to vector<16x32xbf16>
    %c0_9 = arith.constant 0 : index
    %c0_10 = arith.constant 0 : index
    %c0_11 = arith.constant 0 : index
    %31 = vector.load %arg6[%c0_9, %c0_10, %c0_11] : memref<1x32x96xbf16, #tpu.memory_space<vmem>>, vector<1x32x96xbf16>
    %32 = vector.shape_cast %31 : vector<1x32x96xbf16> to vector<32x96xbf16>
    %cst_12 = arith.constant dense<0.000000e+00> : vector<16x96xf32>
    %33 = tpu.matmul %30, %32, %cst_12 {dimension_numbers = #tpu.dot_dimension_numbers<[1], [0], [0], [1], [0, 0, 1, 1], [], []>} : vector<16x32xbf16>, vector<32x96xbf16>, vector<16x96xf32> -> vector<16x96xf32>
    %c0_13 = arith.constant 0 : index
    %c0_14 = arith.constant 0 : index
    %c0_15 = arith.constant 0 : index
    %34 = vector.load %arg4[%c0_13, %c0_14, %c0_15] : memref<1x1x96xf32, #tpu.memory_space<vmem>>, vector<1x1x96xf32>
    %35 = vector.shape_cast %34 : vector<1x1x96xf32> to vector<1x96xf32>
    %36 = vector.broadcast %35 : vector<1x96xf32> to vector<16x96xf32>
    %37 = arith.addf %33, %36 : vector<16x96xf32>
    %38 = arith.truncf %37 : vector<16x96xf32> to vector<16x96xbf16>
    %39 = vector.shape_cast %38 : vector<16x96xbf16> to vector<2x8x96xbf16>
    %40 = vector.extract_strided_slice %39 {offsets = [0, 0, 0], sizes = [2, 8, 8], strides = [1, 1, 1]} : vector<2x8x96xbf16> to vector<2x8x8xbf16>
    %41 = vector.extract_strided_slice %39 {offsets = [0, 0, 32], sizes = [2, 8, 8], strides = [1, 1, 1]} : vector<2x8x96xbf16> to vector<2x8x8xbf16>
    %42 = vector.extract_strided_slice %39 {offsets = [0, 0, 64], sizes = [2, 8, 8], strides = [1, 1, 1]} : vector<2x8x96xbf16> to vector<2x8x8xbf16>
    "tpu.trace_start"() <{level = 10 : i32, message = "bqd,bkd->bqk"}> : () -> ()
    %cst_16 = arith.constant dense<0.000000e+00> : vector<2x8x8xf32>
    %43 = tpu.matmul %40, %41, %cst_16 {dimension_numbers = #tpu.dot_dimension_numbers<[2], [2], [1], [1], [0, 0, 0, 1, 1, 1], [0], [0]>} : vector<2x8x8xbf16>, vector<2x8x8xbf16>, vector<2x8x8xf32> -> vector<2x8x8xf32>
    "tpu.trace_stop"() : () -> ()
    %cst_17 = arith.constant dense<0xFF800000> : vector<2x8xf32>
    %44 = vector.multi_reduction <maximumf>, %43, %cst_17 [2] : vector<2x8x8xf32> to vector<2x8xf32>
    %45 = vector.shape_cast %44 : vector<2x8xf32> to vector<2x8x1xf32>
    %46 = vector.broadcast %45 : vector<2x8x1xf32> to vector<2x8x8xf32>
    %47 = arith.subf %43, %46 : vector<2x8x8xf32>
    %48 = math.exp %47 : vector<2x8x8xf32>
    %cst_18 = arith.constant dense<0.000000e+00> : vector<2x8xf32>
    %49 = vector.multi_reduction <add>, %48, %cst_18 [2] : vector<2x8x8xf32> to vector<2x8xf32>
    %50 = vector.shape_cast %49 : vector<2x8xf32> to vector<2x8x1xf32>
    %51 = tpu.reciprocal %50 {approx = true} : vector<2x8x1xf32> -> vector<2x8x1xf32>
    %52 = vector.broadcast %51 : vector<2x8x1xf32> to vector<2x8x8xf32>
    %53 = arith.mulf %48, %52 : vector<2x8x8xf32>
    %54 = arith.truncf %53 : vector<2x8x8xf32> to vector<2x8x8xbf16>
    "tpu.trace_start"() <{level = 10 : i32, message = "bqk,bkd->bqd"}> : () -> ()
    %cst_19 = arith.constant dense<0.000000e+00> : vector<2x8x8xf32>
    %55 = tpu.matmul %54, %42, %cst_19 {dimension_numbers = #tpu.dot_dimension_numbers<[2], [1], [1], [2], [0, 0, 0, 1, 1, 2], [0], [0]>} : vector<2x8x8xbf16>, vector<2x8x8xbf16>, vector<2x8x8xf32> -> vector<2x8x8xf32>
    "tpu.trace_stop"() : () -> ()
    %56 = vector.extract_strided_slice %39 {offsets = [0, 0, 8], sizes = [2, 8, 8], strides = [1, 1, 1]} : vector<2x8x96xbf16> to vector<2x8x8xbf16>
    %57 = vector.extract_strided_slice %39 {offsets = [0, 0, 40], sizes = [2, 8, 8], strides = [1, 1, 1]} : vector<2x8x96xbf16> to vector<2x8x8xbf16>
    %58 = vector.extract_strided_slice %39 {offsets = [0, 0, 72], sizes = [2, 8, 8], strides = [1, 1, 1]} : vector<2x8x96xbf16> to vector<2x8x8xbf16>
    "tpu.trace_start"() <{level = 10 : i32, message = "bqd,bkd->bqk"}> : () -> ()
    %cst_20 = arith.constant dense<0.000000e+00> : vector<2x8x8xf32>
    %59 = tpu.matmul %56, %57, %cst_20 {dimension_numbers = #tpu.dot_dimension_numbers<[2], [2], [1], [1], [0, 0, 0, 1, 1, 1], [0], [0]>} : vector<2x8x8xbf16>, vector<2x8x8xbf16>, vector<2x8x8xf32> -> vector<2x8x8xf32>
    "tpu.trace_stop"() : () -> ()
    %cst_21 = arith.constant dense<0xFF800000> : vector<2x8xf32>
    %60 = vector.multi_reduction <maximumf>, %59, %cst_21 [2] : vector<2x8x8xf32> to vector<2x8xf32>
    %61 = vector.shape_cast %60 : vector<2x8xf32> to vector<2x8x1xf32>
    %62 = vector.broadcast %61 : vector<2x8x1xf32> to vector<2x8x8xf32>
    %63 = arith.subf %59, %62 : vector<2x8x8xf32>
    %64 = math.exp %63 : vector<2x8x8xf32>
    %cst_22 = arith.constant dense<0.000000e+00> : vector<2x8xf32>
    %65 = vector.multi_reduction <add>, %64, %cst_22 [2] : vector<2x8x8xf32> to vector<2x8xf32>
    %66 = vector.shape_cast %65 : vector<2x8xf32> to vector<2x8x1xf32>
    %67 = tpu.reciprocal %66 {approx = true} : vector<2x8x1xf32> -> vector<2x8x1xf32>
    %68 = vector.broadcast %67 : vector<2x8x1xf32> to vector<2x8x8xf32>
    %69 = arith.mulf %64, %68 : vector<2x8x8xf32>
    %70 = arith.truncf %69 : vector<2x8x8xf32> to vector<2x8x8xbf16>
    "tpu.trace_start"() <{level = 10 : i32, message = "bqk,bkd->bqd"}> : () -> ()
    %cst_23 = arith.constant dense<0.000000e+00> : vector<2x8x8xf32>
    %71 = tpu.matmul %70, %58, %cst_23 {dimension_numbers = #tpu.dot_dimension_numbers<[2], [1], [1], [2], [0, 0, 0, 1, 1, 2], [0], [0]>} : vector<2x8x8xbf16>, vector<2x8x8xbf16>, vector<2x8x8xf32> -> vector<2x8x8xf32>
    "tpu.trace_stop"() : () -> ()
    %72 = vector.extract_strided_slice %39 {offsets = [0, 0, 16], sizes = [2, 8, 8], strides = [1, 1, 1]} : vector<2x8x96xbf16> to vector<2x8x8xbf16>
    %73 = vector.extract_strided_slice %39 {offsets = [0, 0, 48], sizes = [2, 8, 8], strides = [1, 1, 1]} : vector<2x8x96xbf16> to vector<2x8x8xbf16>
    %74 = vector.extract_strided_slice %39 {offsets = [0, 0, 80], sizes = [2, 8, 8], strides = [1, 1, 1]} : vector<2x8x96xbf16> to vector<2x8x8xbf16>
    "tpu.trace_start"() <{level = 10 : i32, message = "bqd,bkd->bqk"}> : () -> ()
    %cst_24 = arith.constant dense<0.000000e+00> : vector<2x8x8xf32>
    %75 = tpu.matmul %72, %73, %cst_24 {dimension_numbers = #tpu.dot_dimension_numbers<[2], [2], [1], [1], [0, 0, 0, 1, 1, 1], [0], [0]>} : vector<2x8x8xbf16>, vector<2x8x8xbf16>, vector<2x8x8xf32> -> vector<2x8x8xf32>
    "tpu.trace_stop"() : () -> ()
    %cst_25 = arith.constant dense<0xFF800000> : vector<2x8xf32>
    %76 = vector.multi_reduction <maximumf>, %75, %cst_25 [2] : vector<2x8x8xf32> to vector<2x8xf32>
    %77 = vector.shape_cast %76 : vector<2x8xf32> to vector<2x8x1xf32>
    %78 = vector.broadcast %77 : vector<2x8x1xf32> to vector<2x8x8xf32>
    %79 = arith.subf %75, %78 : vector<2x8x8xf32>
    %80 = math.exp %79 : vector<2x8x8xf32>
    %cst_26 = arith.constant dense<0.000000e+00> : vector<2x8xf32>
    %81 = vector.multi_reduction <add>, %80, %cst_26 [2] : vector<2x8x8xf32> to vector<2x8xf32>
    %82 = vector.shape_cast %81 : vector<2x8xf32> to vector<2x8x1xf32>
    %83 = tpu.reciprocal %82 {approx = true} : vector<2x8x1xf32> -> vector<2x8x1xf32>
    %84 = vector.broadcast %83 : vector<2x8x1xf32> to vector<2x8x8xf32>
    %85 = arith.mulf %80, %84 : vector<2x8x8xf32>
    %86 = arith.truncf %85 : vector<2x8x8xf32> to vector<2x8x8xbf16>
    "tpu.trace_start"() <{level = 10 : i32, message = "bqk,bkd->bqd"}> : () -> ()
    %cst_27 = arith.constant dense<0.000000e+00> : vector<2x8x8xf32>
    %87 = tpu.matmul %86, %74, %cst_27 {dimension_numbers = #tpu.dot_dimension_numbers<[2], [1], [1], [2], [0, 0, 0, 1, 1, 2], [0], [0]>} : vector<2x8x8xbf16>, vector<2x8x8xbf16>, vector<2x8x8xf32> -> vector<2x8x8xf32>
    "tpu.trace_stop"() : () -> ()
    %88 = vector.extract_strided_slice %39 {offsets = [0, 0, 24], sizes = [2, 8, 8], strides = [1, 1, 1]} : vector<2x8x96xbf16> to vector<2x8x8xbf16>
    %89 = vector.extract_strided_slice %39 {offsets = [0, 0, 56], sizes = [2, 8, 8], strides = [1, 1, 1]} : vector<2x8x96xbf16> to vector<2x8x8xbf16>
    %90 = vector.extract_strided_slice %39 {offsets = [0, 0, 88], sizes = [2, 8, 8], strides = [1, 1, 1]} : vector<2x8x96xbf16> to vector<2x8x8xbf16>
    "tpu.trace_start"() <{level = 10 : i32, message = "bqd,bkd->bqk"}> : () -> ()
    %cst_28 = arith.constant dense<0.000000e+00> : vector<2x8x8xf32>
    %91 = tpu.matmul %88, %89, %cst_28 {dimension_numbers = #tpu.dot_dimension_numbers<[2], [2], [1], [1], [0, 0, 0, 1, 1, 1], [0], [0]>} : vector<2x8x8xbf16>, vector<2x8x8xbf16>, vector<2x8x8xf32> -> vector<2x8x8xf32>
    "tpu.trace_stop"() : () -> ()
    %cst_29 = arith.constant dense<0xFF800000> : vector<2x8xf32>
    %92 = vector.multi_reduction <maximumf>, %91, %cst_29 [2] : vector<2x8x8xf32> to vector<2x8xf32>
    %93 = vector.shape_cast %92 : vector<2x8xf32> to vector<2x8x1xf32>
    %94 = vector.broadcast %93 : vector<2x8x1xf32> to vector<2x8x8xf32>
    %95 = arith.subf %91, %94 : vector<2x8x8xf32>
    %96 = math.exp %95 : vector<2x8x8xf32>
    %cst_30 = arith.constant dense<0.000000e+00> : vector<2x8xf32>
    %97 = vector.multi_reduction <add>, %96, %cst_30 [2] : vector<2x8x8xf32> to vector<2x8xf32>
    %98 = vector.shape_cast %97 : vector<2x8xf32> to vector<2x8x1xf32>
    %99 = tpu.reciprocal %98 {approx = true} : vector<2x8x1xf32> -> vector<2x8x1xf32>
    %100 = vector.broadcast %99 : vector<2x8x1xf32> to vector<2x8x8xf32>
    %101 = arith.mulf %96, %100 : vector<2x8x8xf32>
    %102 = arith.truncf %101 : vector<2x8x8xf32> to vector<2x8x8xbf16>
    "tpu.trace_start"() <{level = 10 : i32, message = "bqk,bkd->bqd"}> : () -> ()
    %cst_31 = arith.constant dense<0.000000e+00> : vector<2x8x8xf32>
    %103 = tpu.matmul %102, %90, %cst_31 {dimension_numbers = #tpu.dot_dimension_numbers<[2], [1], [1], [2], [0, 0, 0, 1, 1, 2], [0], [0]>} : vector<2x8x8xbf16>, vector<2x8x8xbf16>, vector<2x8x8xf32> -> vector<2x8x8xf32>
    "tpu.trace_stop"() : () -> ()
    %104 = tpu.concatenate %55, %71, %87, %103 in 2 : vector<2x8x8xf32>, vector<2x8x8xf32>, vector<2x8x8xf32>, vector<2x8x8xf32> -> vector<2x8x32xf32>
    %105 = vector.shape_cast %104 : vector<2x8x32xf32> to vector<16x32xf32>
    %106 = arith.truncf %105 : vector<16x32xf32> to vector<16x32xbf16>
    %c0_32 = arith.constant 0 : index
    %c0_33 = arith.constant 0 : index
    %c0_34 = arith.constant 0 : index
    %107 = vector.load %arg7[%c0_32, %c0_33, %c0_34] : memref<1x32x32xbf16, #tpu.memory_space<vmem>>, vector<1x32x32xbf16>
    %108 = vector.shape_cast %107 : vector<1x32x32xbf16> to vector<32x32xbf16>
    %cst_35 = arith.constant dense<0.000000e+00> : vector<16x32xf32>
    %109 = tpu.matmul %106, %108, %cst_35 {dimension_numbers = #tpu.dot_dimension_numbers<[1], [0], [0], [1], [0, 0, 1, 1], [], []>} : vector<16x32xbf16>, vector<32x32xbf16>, vector<16x32xf32> -> vector<16x32xf32>
    %110 = vector.extract_strided_slice %5 {offsets = [2, 0], sizes = [1, 32], strides = [1, 1]} : vector<8x32xf32> to vector<1x32xf32>
    %111 = vector.broadcast %110 : vector<1x32xf32> to vector<16x32xf32>
    %112 = arith.addf %109, %111 : vector<16x32xf32>
    %113 = vector.extract_strided_slice %5 {offsets = [3, 0], sizes = [1, 32], strides = [1, 1]} : vector<8x32xf32> to vector<1x32xf32>
    %114 = vector.broadcast %113 : vector<1x32xf32> to vector<16x32xf32>
    %115 = arith.mulf %114, %112 : vector<16x32xf32>
    %116 = arith.addf %3, %115 : vector<16x32xf32>
    %117 = vector.extract_strided_slice %5 {offsets = [4, 0], sizes = [1, 32], strides = [1, 1]} : vector<8x32xf32> to vector<1x32xf32>
    %118 = vector.extract_strided_slice %5 {offsets = [5, 0], sizes = [1, 32], strides = [1, 1]} : vector<8x32xf32> to vector<1x32xf32>
    %cst_36 = arith.constant dense<0.000000e+00> : vector<16xf32>
    %119 = vector.multi_reduction <add>, %116, %cst_36 [1] : vector<16x32xf32> to vector<16xf32>
    %120 = vector.shape_cast %119 : vector<16xf32> to vector<16x1xf32>
    %cst_37 = arith.constant 3.200000e+01 : f32
    %121 = vector.broadcast %cst_37 : f32 to vector<16x1xf32>
    %122 = arith.divf %120, %121 : vector<16x1xf32>
    %123 = arith.mulf %116, %116 : vector<16x32xf32>
    %cst_38 = arith.constant dense<0.000000e+00> : vector<16xf32>
    %124 = vector.multi_reduction <add>, %123, %cst_38 [1] : vector<16x32xf32> to vector<16xf32>
    %125 = vector.shape_cast %124 : vector<16xf32> to vector<16x1xf32>
    %cst_39 = arith.constant 3.200000e+01 : f32
    %126 = vector.broadcast %cst_39 : f32 to vector<16x1xf32>
    %127 = arith.divf %125, %126 : vector<16x1xf32>
    %128 = arith.mulf %122, %122 : vector<16x1xf32>
    %129 = arith.subf %127, %128 : vector<16x1xf32>
    %130 = vector.broadcast %122 : vector<16x1xf32> to vector<16x32xf32>
    %131 = arith.subf %116, %130 : vector<16x32xf32>
    %cst_40 = arith.constant 9.99999974E-6 : f32
    %132 = vector.broadcast %cst_40 : f32 to vector<16x1xf32>
    %133 = arith.addf %129, %132 : vector<16x1xf32>
    %134 = math.rsqrt %133 : vector<16x1xf32>
    %135 = vector.broadcast %134 : vector<16x1xf32> to vector<16x32xf32>
    %136 = arith.mulf %131, %135 : vector<16x32xf32>
    %137 = vector.broadcast %117 : vector<1x32xf32> to vector<16x32xf32>
    %138 = arith.mulf %136, %137 : vector<16x32xf32>
    %139 = vector.broadcast %118 : vector<1x32xf32> to vector<16x32xf32>
    %140 = arith.addf %138, %139 : vector<16x32xf32>
    %141 = arith.truncf %140 : vector<16x32xf32> to vector<16x32xbf16>
    %c0_41 = arith.constant 0 : index
    %c0_42 = arith.constant 0 : index
    %c0_43 = arith.constant 0 : index
    %142 = vector.load %arg8[%c0_41, %c0_42, %c0_43] : memref<1x32x64xbf16, #tpu.memory_space<vmem>>, vector<1x32x64xbf16>
    %143 = vector.shape_cast %142 : vector<1x32x64xbf16> to vector<32x64xbf16>
    %cst_44 = arith.constant dense<0.000000e+00> : vector<16x64xf32>
    %144 = tpu.matmul %141, %143, %cst_44 {dimension_numbers = #tpu.dot_dimension_numbers<[1], [0], [0], [1], [0, 0, 1, 1], [], []>} : vector<16x32xbf16>, vector<32x64xbf16>, vector<16x64xf32> -> vector<16x64xf32>
    %c0_45 = arith.constant 0 : index
    %c0_46 = arith.constant 0 : index
    %c0_47 = arith.constant 0 : index
    %145 = vector.load %arg5[%c0_45, %c0_46, %c0_47] : memref<1x1x64xf32, #tpu.memory_space<vmem>>, vector<1x1x64xf32>
    %146 = vector.shape_cast %145 : vector<1x1x64xf32> to vector<1x64xf32>
    %147 = vector.broadcast %146 : vector<1x64xf32> to vector<16x64xf32>
    %148 = arith.addf %144, %147 : vector<16x64xf32>
    %cst_48 = arith.constant 5.000000e-01 : f32
    %149 = vector.broadcast %cst_48 : f32 to vector<16x64xf32>
    %150 = arith.mulf %149, %148 : vector<16x64xf32>
    %cst_49 = arith.constant 0.707106769 : f32
    %151 = vector.broadcast %cst_49 : f32 to vector<16x64xf32>
    %152 = arith.mulf %148, %151 : vector<16x64xf32>
    %153 = math.erf %152 : vector<16x64xf32>
    %cst_50 = arith.constant 1.000000e+00 : f32
    %154 = vector.broadcast %cst_50 : f32 to vector<16x64xf32>
    %155 = arith.addf %154, %153 : vector<16x64xf32>
    %156 = arith.mulf %150, %155 : vector<16x64xf32>
    %157 = arith.truncf %156 : vector<16x64xf32> to vector<16x64xbf16>
    %c0_51 = arith.constant 0 : index
    %c0_52 = arith.constant 0 : index
    %c0_53 = arith.constant 0 : index
    %158 = vector.load %arg9[%c0_51, %c0_52, %c0_53] : memref<1x64x32xbf16, #tpu.memory_space<vmem>>, vector<1x64x32xbf16>
    %159 = vector.shape_cast %158 : vector<1x64x32xbf16> to vector<64x32xbf16>
    %cst_54 = arith.constant dense<0.000000e+00> : vector<16x32xf32>
    %160 = tpu.matmul %157, %159, %cst_54 {dimension_numbers = #tpu.dot_dimension_numbers<[1], [0], [0], [1], [0, 0, 1, 1], [], []>} : vector<16x64xbf16>, vector<64x32xbf16>, vector<16x32xf32> -> vector<16x32xf32>
    %161 = vector.extract_strided_slice %5 {offsets = [6, 0], sizes = [1, 32], strides = [1, 1]} : vector<8x32xf32> to vector<1x32xf32>
    %162 = vector.broadcast %161 : vector<1x32xf32> to vector<16x32xf32>
    %163 = arith.addf %160, %162 : vector<16x32xf32>
    %164 = vector.extract_strided_slice %5 {offsets = [7, 0], sizes = [1, 32], strides = [1, 1]} : vector<8x32xf32> to vector<1x32xf32>
    %165 = vector.broadcast %164 : vector<1x32xf32> to vector<16x32xf32>
    %166 = arith.mulf %165, %163 : vector<16x32xf32>
    %167 = arith.addf %116, %166 : vector<16x32xf32>
    %c0_55 = arith.constant 0 : index
    %c0_56 = arith.constant 0 : index
    %168 = vector.load %arg11[%c0_55, %c0_56] : memref<16x32xf32, #tpu.memory_space<vmem>>, vector<16x32xf32>
    tpu.vector_store %arg11[%c0_55, %c0_56], %167 {strides = array<i32>} : memref<16x32xf32, #tpu.memory_space<vmem>>, vector<16x32xf32>,
    %c1_i32 = arith.constant 1 : i32
    %169 = arith.cmpi eq, %arg1, %c1_i32 : i32
    %170 = arith.extui %169 : i1 to i32
    %c0_i32_57 = arith.constant 0 : i32
    %171 = arith.cmpi ne, %170, %c0_i32_57 : i32
    scf.if %171 {
      %172 = vector.shape_cast %167 : vector<16x32xf32> to vector<2x8x32xf32>
      %c0_58 = arith.constant 0 : index
      %c0_59 = arith.constant 0 : index
      %c0_60 = arith.constant 0 : index
      %173 = vector.load %arg10[%c0_58, %c0_59, %c0_60] : memref<2x8x32xf32, #tpu.memory_space<vmem>>, vector<2x8x32xf32>
      tpu.vector_store %arg10[%c0_58, %c0_59, %c0_60], %172 {strides = array<i32>} : memref<2x8x32xf32, #tpu.memory_space<vmem>>, vector<2x8x32xf32>,
    } else {
    }
    return
  }
  func.func @transform_0(%arg0: i32, %arg1: i32) -> (i32, i32, i32) {
    %c0_i32 = arith.constant 0 : i32
    %c0_i32_0 = arith.constant 0 : i32
    %c0_i32_1 = arith.constant 0 : i32
    return %arg0, %c0_i32, %c0_i32_0 : i32, i32, i32
  }
  func.func @transform_1(%arg0: i32, %arg1: i32) -> (i32, i32, i32) {
    %c0_i32 = arith.constant 0 : i32
    %c0_i32_0 = arith.constant 0 : i32
    %c0_i32_1 = arith.constant 0 : i32
    return %arg1, %c0_i32, %c0_i32_0 : i32, i32, i32
  }
  func.func @transform_2(%arg0: i32, %arg1: i32) -> (i32, i32, i32) {
    %c0_i32 = arith.constant 0 : i32
    %c0_i32_0 = arith.constant 0 : i32
    %c0_i32_1 = arith.constant 0 : i32
    return %arg1, %c0_i32, %c0_i32_0 : i32, i32, i32
  }
  func.func @transform_3(%arg0: i32, %arg1: i32) -> (i32, i32, i32) {
    %c0_i32 = arith.constant 0 : i32
    %c0_i32_0 = arith.constant 0 : i32
    %c0_i32_1 = arith.constant 0 : i32
    return %arg1, %c0_i32, %c0_i32_0 : i32, i32, i32
  }
  func.func @transform_4(%arg0: i32, %arg1: i32) -> (i32, i32, i32) {
    %c0_i32 = arith.constant 0 : i32
    %c0_i32_0 = arith.constant 0 : i32
    %c0_i32_1 = arith.constant 0 : i32
    return %arg1, %c0_i32, %c0_i32_0 : i32, i32, i32
  }
  func.func @transform_5(%arg0: i32, %arg1: i32) -> (i32, i32, i32) {
    %c0_i32 = arith.constant 0 : i32
    %c0_i32_0 = arith.constant 0 : i32
    %c0_i32_1 = arith.constant 0 : i32
    return %arg1, %c0_i32, %c0_i32_0 : i32, i32, i32
  }
  func.func @transform_6(%arg0: i32, %arg1: i32) -> (i32, i32, i32) {
    %c0_i32 = arith.constant 0 : i32
    %c0_i32_0 = arith.constant 0 : i32
    %c0_i32_1 = arith.constant 0 : i32
    return %arg1, %c0_i32, %c0_i32_0 : i32, i32, i32
  }
  func.func @transform_7(%arg0: i32, %arg1: i32) -> (i32, i32, i32) {
    %c0_i32 = arith.constant 0 : i32
    %c0_i32_0 = arith.constant 0 : i32
    %c0_i32_1 = arith.constant 0 : i32
    return %arg1, %c0_i32, %c0_i32_0 : i32, i32, i32
  }
  func.func @transform_8(%arg0: i32, %arg1: i32) -> (i32, i32, i32) {
    %c0_i32 = arith.constant 0 : i32
    %c0_i32_0 = arith.constant 0 : i32
    %c0_i32_1 = arith.constant 0 : i32
    return %arg0, %c0_i32, %c0_i32_0 : i32, i32, i32
  }
}

</mosaic_0001>

<bundles_post_ra>
// kernel: tpu_custom_call.1
= control target key start
LH: loop header
LB: loop body
LE: loop exit
PB: predicated region body
PF: predicated region fallthrough
CT: control target
= control target key end

     0   :  { %s3644_s0 = inlined_call_operand.hbm [shape: f32[2,8,32], index: 0, kind: input, shape index: {}]   ;;  %s3645_s1 = inlined_call_operand.hbm [shape: f32[2,8,32], index: 1, kind: input, shape index: {}]   ;;  %s3646_s2 = inlined_call_operand.hbm [shape: f32[2,1,96], index: 2, kind: input, shape index: {}]   ;;  %s3647_s3 = inlined_call_operand.hbm [shape: f32[2,1,64], index: 3, kind: input, shape index: {}]   ;;  %s3648_s4 = inlined_call_operand.hbm [shape: bf16[2,32,96], index: 4, kind: input, shape index: {}]   ;;  %s3649_s5 = inlined_call_operand.hbm [shape: bf16[2,32,32], index: 5, kind: input, shape index: {}]   ;;  %s3650_s6 = inlined_call_operand.hbm [shape: bf16[2,32,64], index: 6, kind: input, shape index: {}]   ;;  %s3651_s7 = inlined_call_operand.hbm [shape: bf16[2,64,32], index: 7, kind: input, shape index: {}]   ;;  %s3652_s8 = inlined_call_operand.hbm [shape: f32[2,8,32], index: 8, kind: output, shape index: {}]  }
   0x1   :  { %3671 = sst [smem:[#allocation29_spill]] %s3645_s1 }
   0x2   :  { %3672 = sst [smem:[#allocation30_spill]] %s3647_s3 }
   0x3   :  { %3673 = sst [smem:[#allocation31_spill]] %s3649_s5 }
   0x4   :  { %3674 = sst [smem:[#allocation32_spill]] %s3652_s8 }
   0x5   :  { %13 = vsyncpa [#allocation4], 0 }
   0x6   :  { %14 = vsyncpa [#allocation7], 0 }
   0x7   :  { %16 = vsyncpa [#allocation7 + $0x1], 0 }
   0x8   :  { %17 = vsyncpa [#allocation10], 0 }
   0x9   :  { %19 = vsyncpa [#allocation10 + $0x1], 0 }
   0xa   :  { %20 = vsyncpa [#allocation13], 0 }
   0xb   :  { %22 = vsyncpa [#allocation13 + $0x1], 0 }
   0xc   :  { %23 = vsyncpa [#allocation16], 0 }
   0xd   :  { %25 = vsyncpa [#allocation16 + $0x1], 0 }
   0xe   :  { %26 = vsyncpa [#allocation5], 0  ;;  %s2967_s27 = smov 0   ;;  %s2969_s28 = smov 0  }
   0xf   :  { %s2971_s29 = smov 0   ;;  %s2973_s30 = smov 0  }
  0x10   :  { %s2975_s9 = smov 0   ;;  %s2977_s10 = smov 0  }
  0x11 LB: > { %3675 = sst [smem:[#allocation24_spill]] %s2878_s29  ;;  %s41_s11 = sadd.s32 1, %s2886_s9  ;;  %s2890_s10 = sphi %s2977_s10, %s32_s10   ;;  %s2886_s9 = sphi %s2975_s9, %s3709_s9   ;;  %s2882_s30 = sphi %s2973_s30, %s3708_s30   ;;  %s2878_s29 = sphi %s2971_s29, %s3704_s29   ;;  %s2874_s28 = sphi %s2969_s28, %s3707_s28   ;;  %s2870_s27 = sphi %s2967_s27, %s3706_s27  }
  0x12   : > { %3676 = sst [smem:[#allocation25_spill]] %s2882_s30  ;;  %s77_s12 = sadd.s32 1, %s2878_s29 }
  0x13   : > { %3677 = sst [smem:[#allocation26_spill]] %s2890_s10  ;;  %p42_p0 = scmp.ge.s32.totalorder %s41_s11, 2 }
  0x14   : > { %p84_p1 = scmp.ne.s32.totalorder %s2878_s29, %s2874_s28  ;;  %p85_p2 = scmp.eq.s32.totalorder %s2890_s10, 0 }
  0x15   : > { %s3711_s11 = smov (%p42_p0, %s41_s11), 0  ;;  %p2412_p4 = scmp.lt.s32.totalorder %s2890_s10, 2 }
  0x16   : > { %3678 = sst [smem:[#allocation27_spill]] %s3711_s11  ;;  %p86_p3 = por %p85_p2, %p84_p1 }
  0x17   : > { %s74_s13 = ssub.s32 %s2886_s9, %s3711_s11  ;;  %s3008_s14 = sand.u32 1, %s2890_s10  }
  0x18   : > { %p75_p5 = scmp.eq.s32.totalorder %s74_s13, 0  ;;  %s3011_s15 = sand.u32 1, %s2878_s29  }
  0x19   : > { %s2117_s16 = sshll.u32 %s2886_s9, 7  ;;  %s2116_s18 = sshll.u32 %s3011_s15, 3 }
  0x1a   : > { %s3015_s17 = scalar_select %p75_p5, %s2878_s29, %s77_s12  }
  0x1b   : > { %s3680_s1 = sld [smem:[#allocation29_spill]]  ;;  %p3023_p6 = pnand %p2412_p4, %p86_p3 }
  0x1c   : > { %3679 = sst [smem:[#allocation28_spill]] %s3015_s17  ;;  %s316_s23 = scalar_lea.vmem [#allocation6], %s2116_s18 }
  0x1d   : > { %s3681_s22 = scalar_select %p3023_p6, 1, 0 }
  0x1e   : > { %s323_s24 = sshll.u32 %s316_s23, 4  ;;  %s3654_s25 = scalar_lea.sflag [#allocation7], %s3008_s14  ;;  %s3027_s24 = int_to_ptr.vmem [resolvable:$true] %s323_s24 }
  0x1f   : > { %p3034_p8 = pneg %p3023_p6 }
  0x21   : > { %s3021_s21 = scalar_lea.hbm %s3680_s1, %s2117_s16  ;;  %s2561_s19 = scalar_lea.hbm %s3680_s1, 256 }
  0x22   : > { %s2556_s26 = scalar_lea.hbm %s3021_s21, 128  ;;  %p2562_p11 = scmp.lt.u32.totalorder %s3021_s21, %s3680_s1 }
  0x23   : > { %p2557_p7 = scmp.ne.s32.totalorder %s3021_s21, %s2556_s26  ;;  %p2563_p12 = scmp.lt.u32.totalorder %s2561_s19, %s2556_s26 }
  0x24   : > { %s3682_s12 = scalar_select %p3034_p8, 1, 0 }
  0x25   : > { %p2559_p9 = pnand %p3034_p8, %p2557_p7  ;;  %p2564_p13 = por %p2563_p12, %p2562_p11 }
  0x26   : > { %p2565_p0 = scmp.lt.u32.totalorder %s2556_s26, %s3021_s21 }
  0x27   : > { %p2560_p10 = pneg %p2559_p9 }
  0x28   : > { %p2566_p1 = por %p2565_p0, %p2564_p13 }
  0x2a   : > { %p2567_p2 = pnand %p2566_p1, %p2560_p10 }
  0x2c   : > { %2570 = shalt.err (!%p2567_p2)
}
  0x2d   : > { %s2571_s23 = scalar_lea.vmem %s3027_s24, 128  ;;  %s2892_s13 = smov [#allocation6]  }
  0x2e   : > { %p2572_p3 = scmp.ne.s32.totalorder %s3027_s24, %s2571_s23  ;;  %s2576_s16 = sshll.u32 %s2892_s13, 4  ;;  %s2577_s16 = int_to_ptr.vmem [resolvable:$false] %s2576_s16 }
  0x2f   : > { %s2578_s18 = scalar_lea.vmem %s2577_s16, 256  ;;  %p2579_p7 = scmp.lt.s32.totalorder %s3027_s24, %s2577_s16 }
  0x30   : > { %p2574_p4 = pnand %p2572_p3, %p3034_p8  ;;  %p2580_p9 = scmp.lt.s32.totalorder %s2578_s18, %s2571_s23 }
  0x32   : > { %p2575_p5 = pneg %p2574_p4  ;;  %p2581_p11 = por %p2580_p9, %p2579_p7 }
  0x34   : > { %p2582_p12 = pnand %p2581_p11, %p2575_p5 }
  0x36   : > { %2585 = shalt.err (!%p2582_p12)
}
  0x37   : > { %2392 = dma.hbm_to_vmem [thread:$0]  (!%p3023_p6), %s3021_s21, 128, %s3027_s24, %s3654_s25  }
  0x38   : > { %s2118_s26 = sshll.u32 %s2886_s9, 4  ;;  %s3683_s3 = sld [smem:[#allocation30_spill]] }
  0x39   : > { %s3063_s23 = scalar_lea.hbm %s3646_s2, %s2118_s26  ;;  %s350_s1 = scalar_lea.vmem [#allocation9], %s3011_s15 }
  0x3a   : > { %s357_s11 = sshll.u32 %s350_s1, 4  ;;  %s3074_s21 = sshll.u32 %s3011_s15, 4  ;;  %s3071_s11 = int_to_ptr.vmem [resolvable:$true] %s357_s11 }
  0x3b   : > { %s3655_s24 = scalar_lea.sflag [#allocation10], %s3008_s14 }
  0x3e   : > { %s3068_s18 = scalar_lea.hbm %s3683_s3, %s2118_s26  ;;  %s2591_s26 = scalar_lea.hbm %s3683_s3, 32 }
  0x3f   : > { %s2586_s25 = scalar_lea.hbm %s3068_s18, 16  ;;  %p2592_p1 = scmp.lt.u32.totalorder %s3068_s18, %s3683_s3 }
  0x40   : > { %p2587_p10 = scmp.ne.s32.totalorder %s3068_s18, %s2586_s25  ;;  %p2593_p2 = scmp.lt.u32.totalorder %s2591_s26, %s2586_s25 }
  0x41   : > { %p2595_p4 = scmp.lt.u32.totalorder %s2586_s25, %s3068_s18 }
  0x42   : > { %p2589_p13 = pnand %p2587_p10, %p3034_p8  ;;  %p2594_p3 = por %p2593_p2, %p2592_p1 }
  0x44   : > { %p2590_p0 = pneg %p2589_p13  ;;  %p2596_p5 = por %p2595_p4, %p2594_p3 }
  0x46   : > { %p2597_p7 = pnand %p2596_p5, %p2590_p0 }
  0x48   : > { %2600 = shalt.err (!%p2597_p7)
}
  0x49   : > { %s2601_s1 = scalar_lea.vmem %s3071_s11, 16  ;;  %s2893_s19 = smov [#allocation9]  }
  0x4a   : > { %p2602_p9 = scmp.ne.s32.totalorder %s3071_s11, %s2601_s1  ;;  %s2606_s20 = sshll.u32 %s2893_s19, 4  ;;  %s2607_s20 = int_to_ptr.vmem [resolvable:$false] %s2606_s20 }
  0x4b   : > { %s2608_s13 = scalar_lea.vmem %s2607_s20, 32  ;;  %p2609_p10 = scmp.lt.s32.totalorder %s3071_s11, %s2607_s20 }
  0x4c   : > { %p2604_p11 = pnand %p2602_p9, %p3034_p8  ;;  %p2610_p13 = scmp.lt.s32.totalorder %s2608_s13, %s2601_s1 }
  0x4e   : > { %p2605_p12 = pneg %p2604_p11  ;;  %p2611_p1 = por %p2610_p13, %p2609_p10 }
  0x50   : > { %p2612_p2 = pnand %p2611_p1, %p2605_p12 }
  0x52   : > { %2615 = shalt.err (!%p2612_p2)
}
  0x53   : > { %2398 = dma.hbm_to_vmem [thread:$0]  (!%p3023_p6), %s3068_s18, 16, %s3071_s11, %s3655_s24  }
  0x54   : > { %s3101_s25 = sshll.u32 %s2886_s9, 8  ;;  %s3684_s5 = sld [smem:[#allocation31_spill]] }
  0x55   : > { %s389_s19 = scalar_lea.vmem [#allocation12], %s3074_s21  ;;  %s3656_s13 = scalar_lea.sflag [#allocation13], %s3008_s14 }
  0x56   : > { %s396_s20 = sshll.u32 %s389_s19, 4  ;;  %s3110_s20 = int_to_ptr.vmem [resolvable:$true] %s396_s20 }
  0x5a   : > { %s3107_s1 = scalar_lea.hbm %s3684_s5, %s3101_s25  ;;  %s2621_s26 = scalar_lea.hbm %s3684_s5, 512 }
  0x5b   : > { %s2616_s3 = scalar_lea.hbm %s3107_s1, 256  ;;  %p2622_p5 = scmp.lt.u32.totalorder %s3107_s1, %s3684_s5 }
  0x5c   : > { %p2617_p0 = scmp.ne.s32.totalorder %s3107_s1, %s2616_s3  ;;  %p2623_p7 = scmp.lt.u32.totalorder %s2621_s26, %s2616_s3 }
  0x5d   : > { %p2625_p11 = scmp.lt.u32.totalorder %s2616_s3, %s3107_s1 }
  0x5e   : > { %p2619_p3 = pnand %p2617_p0, %p3034_p8  ;;  %p2624_p9 = por %p2623_p7, %p2622_p5 }
  0x60   : > { %p2620_p4 = pneg %p2619_p3  ;;  %p2626_p12 = por %p2625_p11, %p2624_p9 }
  0x62   : > { %p2627_p10 = pnand %p2626_p12, %p2620_p4 }
  0x64   : > { %2630 = shalt.err (!%p2627_p10)
}
  0x65   : > { %s2631_s19 = scalar_lea.vmem %s3110_s20, 256  ;;  %s2894_s11 = smov [#allocation12]  }
  0x66   : > { %p2632_p13 = scmp.ne.s32.totalorder %s3110_s20, %s2631_s19  ;;  %s2636_s18 = sshll.u32 %s2894_s11, 4  ;;  %s2637_s18 = int_to_ptr.vmem [resolvable:$false] %s2636_s18 }
  0x67   : > { %s2638_s24 = scalar_lea.vmem %s2637_s18, 512  ;;  %p2639_p0 = scmp.lt.s32.totalorder %s3110_s20, %s2637_s18 }
  0x68   : > { %p2634_p1 = pnand %p2632_p13, %p3034_p8  ;;  %p2640_p3 = scmp.lt.s32.totalorder %s2638_s24, %s2631_s19 }
  0x6a   : > { %p2635_p2 = pneg %p2634_p1  ;;  %p2641_p5 = por %p2640_p3, %p2639_p0 }
  0x6c   : > { %p2642_p7 = pnand %p2641_p5, %p2635_p2 }
  0x6e   : > { %2645 = shalt.err (!%p2642_p7)
}
  0x6f   : > { %s3657_s3 = smov 64   ;;  %s3659_s26 = smov 4  }
  0x70   : > { %2404 = dma.hbm_to_vmem [thread:$0]  (!%p3023_p6), %s3107_s1, 256, %s3110_s20, %s3656_s13, %s3657_s3, %s3657_s3, %s3659_s26  }
  0x71   : > { %s3140_s16 = sadd.s32 4294967295, %s2890_s10   ;;  %p90_p4 = scmp.ne.s32.totalorder %s2874_s28, %s2870_s27 }
  0x72   : > { %p3664_p9 = scmp.eq.s32.totalorder %s3140_s16, 0  ;;  %p2113_p11 = scmp.ge.s32.totalorder %s2890_s10, 1 }
  0x73   : > { %p283_p12 = scmp.lt.s32.totalorder %s2890_s10, 3  ;;  %s2897_s1 = smov [#allocation3]  }
  0x74   : > { %p3149_p10 = por %p3664_p9, %p90_p4  ;;  %s298_s20 = sshll.u32 %s2897_s1, 4  ;;  %s299_s20 = int_to_ptr.vmem [resolvable:$true] %s298_s20 }
  0x75   : > { %p3153_p13 = pnand %p2113_p11, %p283_p12  ;;  %s333_s18 = scalar_lea.vmem [#allocation8], %s3011_s15 }
  0x76   : > { %s3685_s19 = scalar_select %p3149_p10, 1, 0 }
  0x77   : > { %s3686_s11 = scalar_select %p3153_p13, 1, 0 }
  0x78   : > { %p2385_p1 = pneg %p3153_p13  ;;  %s340_s24 = sshll.u32 %s333_s18, 4  ;;  %s3166_s24 = int_to_ptr.vmem [resolvable:$true] %s340_s24 }
  0x79   : > { %s3172_s26 = scalar_lea.hbm %s3648_s4, %s3101_s25  ;;  %s2646_s17 = scalar_lea.hbm %s3644_s0, 256 }
  0x7a   : > { %p3161_p2 = pnand %p2385_p1, %p3664_p9  ;;  %p2647_p0 = scmp.ne.s32.totalorder %s3644_s0, %s2646_s17 }
  0x7b   : > { %p2653_p4 = scmp.lt.u32.totalorder %s2646_s17, %s3644_s0 }
  0x7c   : > { %p2648_p3 = pneg %p3161_p2 }
  0x7e   : > { %p2649_p5 = pnand %p2648_p3, %p2647_p0 }
  0x80   : > { %p2650_p7 = pneg %p2649_p5 }
  0x82   : > { %p2655_p11 = pnand %p2653_p4, %p2650_p7 }
  0x84   : > { %2658 = shalt.err (!%p2655_p11)
}
  0x85   : > { %s2659_s13 = scalar_lea.vmem %s299_s20, 256  ;;  %p2667_p10 = scmp.lt.s32.totalorder %s299_s20, %s299_s20 }
  0x86   : > { %p2660_p12 = scmp.ne.s32.totalorder %s299_s20, %s2659_s13  ;;  %p2668_p13 = scmp.lt.s32.totalorder %s2659_s13, %s2659_s13 }
  0x88   : > { %p2662_p1 = pnand %p2660_p12, %p2648_p3  ;;  %p2669_p6 = por %p2668_p13, %p2667_p10 }
  0x8a   : > { %p2663_p9 = pneg %p2662_p1 }
  0x8c   : > { %p2670_p8 = pnand %p2669_p6, %p2663_p9 }
  0x8e   : > { %2673 = shalt.err (!%p2670_p8)
}
  0x8f   : > { %s2898_s5 = smov 128   ;;  %s2899_s8 = smov 8  }
  0x90   : > { %2388 = dma.hbm_to_vmem [thread:$0]  (!%p3161_p2), %s3644_s0, 256, %s299_s20, [#allocation4], %s2898_s5, %s2898_s5, %s2899_s8  }
  0x91   : > { %s2674_s17 = scalar_lea.hbm %s3063_s23, 16  ;;  %p3688_p3 = scmp.ne.s32.totalorder %s3682_s12, 0 }
  0x92   : > { %p2675_p0 = scmp.ne.s32.totalorder %s3063_s23, %s2674_s17  ;;  %s2679_s18 = scalar_lea.hbm %s3646_s2, 32 }
  0x93   : > { %p2680_p6 = scmp.lt.u32.totalorder %s3063_s23, %s3646_s2  ;;  %p2681_p8 = scmp.lt.u32.totalorder %s2679_s18, %s2674_s17 }
  0x94   : > { %p2677_p5 = pnand %p2675_p0, %p3688_p3  ;;  %p2683_p13 = scmp.lt.u32.totalorder %s2674_s17, %s3063_s23 }
  0x95   : > { %p2682_p9 = por %p2681_p8, %p2680_p6 }
  0x96   : > { %p2678_p10 = pneg %p2677_p5 }
  0x97   : > { %p2684_p7 = por %p2683_p13, %p2682_p9 }
  0x99   : > { %p2685_p4 = pnand %p2684_p7, %p2678_p10 }
  0x9b   : > { %2688 = shalt.err (!%p2685_p4)
}
  0x9c   : > { %s2689_s20 = scalar_lea.vmem %s3166_s24, 16  ;;  %s2900_s27 = smov [#allocation8]  }
  0x9d   : > { %p2690_p2 = scmp.ne.s32.totalorder %s3166_s24, %s2689_s20  ;;  %s2694_s5 = sshll.u32 %s2900_s27, 4  ;;  %s2695_s5 = int_to_ptr.vmem [resolvable:$false] %s2694_s5 }
  0x9e   : > { %s2696_s30 = scalar_lea.vmem %s2695_s5, 32  ;;  %p2697_p1 = scmp.lt.s32.totalorder %s3166_s24, %s2695_s5 }
  0x9f   : > { %p2692_p11 = pnand %p2690_p2, %p3688_p3  ;;  %p2698_p0 = scmp.lt.s32.totalorder %s2696_s30, %s2689_s20 }
  0xa1   : > { %p2693_p12 = pneg %p2692_p11  ;;  %p2699_p5 = por %p2698_p0, %p2697_p1 }
  0xa3   : > { %p2700_p6 = pnand %p2699_p5, %p2693_p12 }
  0xa5   : > { %2703 = shalt.err (!%p2700_p6)
}
  0xa6   : > { %p3689_p10 = scmp.ne.s32.totalorder %s3681_s22, 0  ;;  %s3690_s8 = scalar_lea.sflag [#allocation7], %s3008_s14 }
  0xa7   : > { %s368_s29 = scalar_lea.vmem [#allocation11], %s3074_s21  ;;  %s3220_s1 = scalar_lea.hbm %s3650_s6, %s3101_s25 }
  0xa8   : > { %2395 = dma.hbm_to_vmem [thread:$0]  (!%p3689_p10), %s3063_s23, 16, %s3166_s24, %s3690_s8  }
  0xa9   : > { %s375_s10 = sshll.u32 %s368_s29, 4  ;;  %s2704_s18 = scalar_lea.hbm %s3172_s26, 256  ;;  %s3214_s10 = int_to_ptr.vmem [resolvable:$true] %s375_s10 }
  0xaa   : > { %p2705_p8 = scmp.ne.s32.totalorder %s3172_s26, %s2704_s18  ;;  %s2709_s27 = scalar_lea.hbm %s3648_s4, 512 }
  0xab   : > { %p2710_p7 = scmp.lt.u32.totalorder %s3172_s26, %s3648_s4  ;;  %p2711_p4 = scmp.lt.u32.totalorder %s2709_s27, %s2704_s18 }
  0xac   : > { %p2707_p9 = pnand %p2705_p8, %p3688_p3  ;;  %p2713_p11 = scmp.lt.u32.totalorder %s2704_s18, %s3172_s26 }
  0xad   : > { %p2712_p2 = por %p2711_p4, %p2710_p7 }
  0xae   : > { %p2708_p13 = pneg %p2707_p9 }
  0xaf   : > { %p2714_p12 = por %p2713_p11, %p2712_p2 }
  0xb1   : > { %p2715_p1 = pnand %p2714_p12, %p2708_p13 }
  0xb3   : > { %2718 = shalt.err (!%p2715_p1)
}
  0xb4   : > { %s2719_s25 = scalar_lea.vmem %s3214_s10, 256  ;;  %s2901_s24 = smov [#allocation11]  }
  0xb5   : > { %p2720_p0 = scmp.ne.s32.totalorder %s3214_s10, %s2719_s25  ;;  %s2724_s30 = sshll.u32 %s2901_s24, 4  ;;  %s2725_s30 = int_to_ptr.vmem [resolvable:$false] %s2724_s30 }
  0xb6   : > { %s2726_s8 = scalar_lea.vmem %s2725_s30, 512  ;;  %p2727_p8 = scmp.lt.s32.totalorder %s3214_s10, %s2725_s30 }
  0xb7   : > { %p2722_p5 = pnand %p2720_p0, %p3688_p3  ;;  %p2728_p9 = scmp.lt.s32.totalorder %s2726_s8, %s2719_s25 }
  0xb9   : > { %p2723_p6 = pneg %p2722_p5  ;;  %p2729_p7 = por %p2728_p9, %p2727_p8 }
  0xbb   : > { %p2730_p4 = pnand %p2729_p7, %p2723_p6 }
  0xbd   : > { %2733 = shalt.err (!%p2730_p4)
}
  0xbe   : > { %s3691_s29 = smov 4   ;;  %s3692_s17 = smov 64  }
  0xbf   : > { %s3693_s3 = scalar_lea.sflag [#allocation10], %s3008_s14  ;;  %s410_s18 = scalar_lea.vmem [#allocation14], %s3074_s21 }
  0xc0   : > { %2401 = dma.hbm_to_vmem [thread:$0]  (!%p3689_p10), %s3172_s26, 256, %s3214_s10, %s3693_s3, %s3692_s17, %s3692_s17, %s3691_s29  }
  0xc1   : > { %s417_s13 = sshll.u32 %s410_s18, 4  ;;  %s2129_s20 = sshll.u32 %s3011_s15, 5  ;;  %s3249_s13 = int_to_ptr.vmem [resolvable:$true] %s417_s13 }
  0xc2   : > { %s2734_s27 = scalar_lea.hbm %s3220_s1, 256  ;;  %s2739_s25 = scalar_lea.hbm %s3650_s6, 512 }
  0xc3   : > { %p2735_p13 = scmp.ne.s32.totalorder %s3220_s1, %s2734_s27  ;;  %p2740_p12 = scmp.lt.u32.totalorder %s3220_s1, %s3650_s6 }
  0xc4   : > { %p2741_p1 = scmp.lt.u32.totalorder %s2739_s25, %s2734_s27  ;;  %p2743_p5 = scmp.lt.u32.totalorder %s2734_s27, %s3220_s1 }
  0xc5   : > { %p2737_p2 = pnand %p2735_p13, %p3688_p3 }
  0xc6   : > { %p2742_p0 = por %p2741_p1, %p2740_p12 }
  0xc7   : > { %p2738_p11 = pneg %p2737_p2 }
  0xc8   : > { %p2744_p6 = por %p2743_p5, %p2742_p0 }
  0xca   : > { %p2745_p8 = pnand %p2744_p6, %p2738_p11 }
  0xcc   : > { %2748 = shalt.err (!%p2745_p8)
}
  0xcd   : > { %s2749_s21 = scalar_lea.vmem %s3249_s13, 256  ;;  %s2902_s26 = smov [#allocation14]  }
  0xce   : > { %p2750_p9 = scmp.ne.s32.totalorder %s3249_s13, %s2749_s21  ;;  %s2754_s10 = sshll.u32 %s2902_s26, 4  ;;  %s2755_s10 = int_to_ptr.vmem [resolvable:$false] %s2754_s10 }
  0xcf   : > { %s2756_s8 = scalar_lea.vmem %s2755_s10, 512  ;;  %p2757_p13 = scmp.lt.s32.totalorder %s3249_s13, %s2755_s10 }
  0xd0   : > { %p2752_p7 = pnand %p2750_p9, %p3688_p3  ;;  %p2758_p2 = scmp.lt.s32.totalorder %s2756_s8, %s2749_s21 }
  0xd2   : > { %p2753_p4 = pneg %p2752_p7  ;;  %p2759_p12 = por %p2758_p2, %p2757_p13 }
  0xd4   : > { %p2760_p1 = pnand %p2759_p12, %p2753_p4 }
  0xd6   : > { %2763 = shalt.err (!%p2760_p1)
}
  0xd7   : > { %s3694_s3 = scalar_lea.sflag [#allocation13], %s3008_s14  ;;  %s2182_s18 = sshll.u32 %s2886_s9, 9 }
  0xd8   : > { %2407 = dma.hbm_to_vmem [thread:$0]  (!%p3689_p10), %s3220_s1, 256, %s3249_s13, %s3694_s3, %s3692_s17, %s3692_s17, %s3691_s29  }
  0xd9   : > { %s3282_s23 = scalar_lea.hbm %s3651_s7, %s2182_s18  ;;  %s431_s25 = scalar_lea.vmem [#allocation15], %s2129_s20 }
  0xda   : > { %s438_s14 = sshll.u32 %s431_s25, 4  ;;  %s428_s24 = scalar_lea.sflag [#allocation16], %s3011_s15  ;;  %s3286_s14 = int_to_ptr.vmem [resolvable:$true] %s438_s14 }
  0xdb   : > { %s2764_s30 = scalar_lea.hbm %s3282_s23, 512  ;;  %s2769_s21 = scalar_lea.hbm %s3651_s7, 1024 }
  0xdc   : > { %p2765_p11 = scmp.ne.s32.totalorder %s3282_s23, %s2764_s30  ;;  %p2770_p6 = scmp.lt.u32.totalorder %s3282_s23, %s3651_s7 }
  0xdd   : > { %p2771_p8 = scmp.lt.u32.totalorder %s2769_s21, %s2764_s30  ;;  %p2773_p7 = scmp.lt.u32.totalorder %s2764_s30, %s3282_s23 }
  0xde   : > { %p2767_p0 = pnand %p2765_p11, %p3688_p3 }
  0xdf   : > { %p2772_p9 = por %p2771_p8, %p2770_p6 }
  0xe0   : > { %p2768_p5 = pneg %p2767_p0 }
  0xe1   : > { %p2774_p4 = por %p2773_p7, %p2772_p9 }
  0xe3   : > { %p2775_p13 = pnand %p2774_p4, %p2768_p5 }
  0xe5   : > { %2778 = shalt.err (!%p2775_p13)
}
  0xe6   : > { %s2779_s20 = scalar_lea.vmem %s3286_s14, 512  ;;  %s2903_s8 = smov [#allocation15]  }
  0xe7   : > { %p2780_p2 = scmp.ne.s32.totalorder %s3286_s14, %s2779_s20  ;;  %s2784_s3 = sshll.u32 %s2903_s8, 4  ;;  %s2785_s3 = int_to_ptr.vmem [resolvable:$false] %s2784_s3 }
  0xe8   : > { %s2786_s18 = scalar_lea.vmem %s2785_s3, 1024  ;;  %p2787_p11 = scmp.lt.s32.totalorder %s3286_s14, %s2785_s3 }
  0xe9   : > { %p2782_p12 = pnand %p2780_p2, %p3688_p3  ;;  %p2788_p0 = scmp.lt.s32.totalorder %s2786_s18, %s2779_s20 }
  0xeb   : > { %p2783_p1 = pneg %p2782_p12  ;;  %p2789_p6 = por %p2788_p0, %p2787_p11 }
  0xed   : > { %p2790_p8 = pnand %p2789_p6, %p2783_p1 }
  0xef   : > { %2793 = shalt.err (!%p2790_p8)
}
  0xf0   : > { %2410 = dma.hbm_to_vmem [thread:$0]  (!%p3689_p10), %s3282_s23, 512, %s3286_s14, %s428_s24, %s3692_s17, %s3692_s17, %s3691_s29  }
  0xf1   : > { %p3695_p3 = scmp.ne.s32.totalorder %s3686_s11, 0 }
  0xf2   : > { %p3696_p5 = scmp.eq.s32.totalorder (!%p3695_p3), %s3140_s16, 0 }
  0xf3   : > { %450 = sbr.rel (%p3695_p3) target bundleno = 4156 (0x103c), region = 52 }
  0xfa   : > { %2845 = dma.done.wait (%p3696_p5), [#allocation4], 256   ;;  %p3697_p9 = pmov %p3696_p5 }
  0xfb   : > { %s456_s22 = sand.u32 1, %s3140_s16   ;;  %s3323_s12 = sand.u32 1, %s2874_s28  }
  0xfc   : > { %2847 = vsyncadd (%p3697_p9), [#allocation4], 4294967040  ;;  %s2134_s15 = sshll.u32 %s3323_s12, 3  ;;  %s457_s27 = scalar_lea.sflag [#allocation7], %s456_s22 }
  0xfd   : > { %s3326_s5 = scalar_lea.vmem [#allocation6], %s2134_s15  ;;  %p3698_p10 = scmp.ne.s32.totalorder %s3685_s19, 0 }
  0xff   : > { %2849 = dma.done.wait (%p3698_p10), %s457_s27, 144  }
 0x100   : > { %2851 = vsyncadd (%p3698_p10), %s457_s27, 4294967152  ;;  %s468_s11 = scalar_lea.vmem [#allocation8], %s3323_s12  ;;  %s474_s29 = scalar_lea.sflag [#allocation10], %s456_s22 }
 0x101   : > { %s476_s17 = scalar_lea.vmem [#allocation9], %s3323_s12 }
 0x102   : > { %2853 = dma.done.wait (%p3698_p10), %s474_s29, 272  }
 0x103   : > { %2855 = vsyncadd (%p3698_p10), %s474_s29, 4294967024  ;;  %s3339_s23 = sshll.u32 %s3323_s12, 4  ;;  %s491_s14 = scalar_lea.sflag [#allocation13], %s456_s22 }
 0x104   : > { %s485_s25 = scalar_lea.vmem [#allocation11], %s3339_s23  ;;  %s494_s24 = scalar_lea.vmem [#allocation12], %s3339_s23 }
 0x105   : > { %2857 = dma.done.wait (%p3698_p10), %s491_s14, 512  }
 0x106   : > { %2859 = vsyncadd (%p3698_p10), %s491_s14, 4294966784  ;;  %s2138_s30 = sshll.u32 %s3323_s12, 5  ;;  %s503_s1 = scalar_lea.vmem [#allocation14], %s3339_s23 }
 0x107   : > { %s509_s13 = scalar_lea.sflag [#allocation16], %s3323_s12  ;;  %s3350_s21 = scalar_lea.vmem [#allocation15], %s2138_s30 }
 0x108   : > { %2861 = dma.done.wait (%p3698_p10), %s509_s13, 512  }
 0x109   : > { %2863 = vsyncadd (%p3698_p10), %s509_s13, 4294966784  ;;  %s3699_s26 = sld [smem:[#allocation25_spill]] }
 0x10f   : > { %p2139_p7 = scmp.ne.s32.totalorder %s3699_s26, 0 }
 0x110   : > { %v575_v0 = vld [vmem:[#allocation3] sm:$0xff] (!%p2139_p7)  ;;  %vm577_vm0 = vcmask (!%p2139_p7), 261120   ;;  %v576_v1 = vld [vmem:[#allocation3 + $0x8] sm:$0xff] (!%p2139_p7) }
 0x111   : > { %574 = sbr.rel (%p2139_p7) target bundleno = 280 (0x118), region = 88  ;;  %578 = vst.msk [vmem:[#allocation2] sm:$0xff] (!%p2139_p7), %vm577_vm0, %v575_v0  ;;  %579 = vst.msk [vmem:[#allocation2 + $0x8] sm:$0xff] (!%p2139_p7), %vm577_vm0, %v576_v1 }
 0x118 PF: > { %v3357_v2 = vld [vmem:[#allocation2] sm:$0xff]  ;;  %vm583_vm1 = vcmask 261120   ;;  %v3359_v3 = vld [vmem:[#allocation2 + $0x8] sm:$0xff]  ;;  %v2904_v11 = vmov 0.0   ;;  %vm2905_vm2 = vmmov 0   ;;  %v615_v25 = vlaneseq  ;;  %s2906_s19 = smov 96  }
 0x119   : > { %v584_v4 = vsel %vm583_vm1, %v3357_v2, 0.0  ;;  %v593_v5 = vmul.f32 %v3357_v2, %v3357_v2  ;;  %v587_v6 = vsel %vm583_vm1, %v3359_v3, 0.0  ;;  %v594_v7 = vmul.f32 %v3359_v3, %v3359_v3  ;;  %v2502_v10 = vld [vmem:[%s485_s25] sm:$0xff]   ;;  %2231 = vmatprep.subr.bf16.mxu0 %v2904_v11  ;;  %2235 = vmatprep.mubr.msk.bf16.mxu0 %vm2905_vm2, %v2904_v11  ;;  %v2503_v12 = vld [vmem:[%s485_s25 + $0x8] sm:$0xff]   ;;  %s2907_s10 = smov 64   ;;  %s2908_s20 = smov 88  }
 0x11a   : > { %585 = vadd.xlane.f32.xlu0 %v584_v4  ;;  %2232 = vmatpush3.bf16.msra.mxu0 %v2502_v10  ;;  %v3383_v28 = vshrl.u32 %v615_v25, 7  ;;  %v3387_v30 = vld [vmem:[%s3326_s5] sm:$0xff]  ;;  %vm703_vm3 = vcmask 64512   ;;  %vm827_vm4 = vcmask 1043456   ;;  %s2909_s8 = smov 120   ;;  %s2910_s3 = smov 56  }
 0x11b   : > { %v595_v8 = vsel %vm583_vm1, %v593_v5, 0.0  ;;  %v598_v9 = vsel %vm583_vm1, %v594_v7, 0.0  ;;  %2239 = vmatprep.subr.bf16.mxu1 %v2904_v11  ;;  %2233 = vmatprep.subr.bf16.mxu0 %v2904_v11  ;;  %v2140_v45 = vld [vmem:[%s468_s11] ss:$0 sm:$0xff]  ;;  %s2911_s18 = smov 80   ;;  %s2912_s22 = smov 112  }
 0x11c   : > { %596 = vadd.xlane.f32.xlu1 %v595_v8  ;;  %2241 = vmatprep.mubr.msk.bf16.mxu1 %vm2905_vm2, %v2904_v11  ;;  %v617_v29 = vsub.s32 0, %v3383_v28  ;;  %v623_v35 = vsub.s32 1, %v3383_v28  ;;  %s2913_s15 = smov 48   ;;  %s2914_s27 = smov 72   ;;  %vm1605_vm5 = vcmask 130048   ;;  %vm1608_vm6 = vcmask 195584  }
 0x11d   : > { %s2915_s5 = smov 104   ;;  %s2916_s11 = smov 40   ;;  %vm1841_vm7 = vcmask 523264  }
 0x11e   : > { %588 = vadd.xlane.f32.xlu0 %v587_v6  ;;  %2234 = vmatpush3.bf16.msra.mxu0 %v2503_v12  ;;  %v618_v34 = vrot.slane %v3387_v30, %v617_v29  ;;  %v624_v40 = vrot.slane %v3387_v30, %v623_v35  ;;  %s2917_s29 = smov 8   ;;  %s2918_s25 = smov 16  }
 0x11f   : > { %2245 = vmatprep.subr.bf16.mxu0 %v2904_v11  ;;  %s2919_s14 = smov 24   ;;  %s3700_s12 = sld [smem:[#allocation25_spill]] }
 0x120   : > { %599 = vadd.xlane.f32.xlu1 %v598_v9 }
 0x125   : > { %p2174_p4 = scmp.ne.s32.totalorder %s3700_s12, 1 }
 0x1a7   : > { %v586_v13 = vpop.xlane.xlu0 %585 }
 0x1a8   : > { %v591_v14 = vmul.f32 0.03125, %v586_v13 }
 0x1a9   : > { %v597_v15 = vpop.xlane.xlu1 %596 }
 0x1aa   : > { %v603_v16 = vmul.f32 %v591_v14, %v591_v14  ;;  %v601_v17 = vmul.f32 0.03125, %v597_v15  ;;  %v607_v31 = vsub.f32 %v3357_v2, %v591_v14 }
 0x1ab   : > { %v589_v18 = vpop.xlane.xlu0 %588 }
 0x1ac   : > { %v605_v19 = vsub.f32 %v601_v17, %v603_v16  ;;  %v592_v20 = vmul.f32 0.03125, %v589_v18 }
 0x1ad   : > { %v600_v21 = vpop.xlane.xlu1 %599 }
 0x1ae   : > { %v609_v22 = vadd.f32 1e-05, %v605_v19  ;;  %v604_v23 = vmul.f32 %v592_v20, %v592_v20  ;;  %v602_v24 = vmul.f32 0.03125, %v600_v21  ;;  %v608_v36 = vsub.f32 %v3359_v3, %v592_v20 }
 0x1b0   : > { %2512 = vrsqrt.f32 %v609_v22  ;;  %v606_v26 = vsub.f32 %v602_v24, %v604_v23 }
 0x1b2   : > { %v610_v27 = vadd.f32 1e-05, %v606_v26 }
 0x1b4   : > { %2514 = vrsqrt.f32 %v610_v27 }
 0x1ba   : > { %v2513_v32 = vpop.eup %2512 }
 0x1bb   : > { %v613_v33 = vmul.f32 %v2513_v32, %v607_v31 }
 0x1bd   : > { %v619_v39 = vmul.f32 %v618_v34, %v613_v33 }
 0x1be   : > { %v2515_v37 = vpop.eup %2514 }
 0x1bf   : > { %v614_v38 = vmul.f32 %v2515_v37, %v608_v36  ;;  %v625_v42 = vadd.f32 %v624_v40, %v619_v39 }
 0x1c1   : > { %v620_v41 = vmul.f32 %v618_v34, %v614_v38 }
 0x1c3   : > { %v626_v43 = vadd.f32 %v624_v40, %v620_v41 }
 0x1c5   : > { %v627_v44 = vpack.c.bf16 %v626_v43, %v625_v42 }
 0x1c7   : > { %2236 = vmatmul.mubr.msk.bf16.vlgmr.msra.gmra.mrb[0].mxu0 %vm583_vm1, %v627_v44 }
 0x1c8   : > { %2247 = vmatprep.mubr.msk.bf16.mxu0 %vm2905_vm2, %v2904_v11 }
 0x29a   : > { %v688_v46 = vpop.f32.mrb[0].mxu0 }
 0x29b   : > { %v689_v47 = vadd.f32 %v2140_v45, %v688_v46  ;;  %v2237_v48 = vpop.f32.mrb[1].mxu0 }
 0x29c   : > { %v691_v49 = vpop.f32.mrb[2].mxu0 }
 0x29d   : > { %v3399_v50 = vpack.c.bf16 %v689_v47, %v689_v47  ;;  %v692_v51 = vadd.f32 %v2140_v45, %v691_v49  ;;  %v2238_v52 = vpop.f32.mrb[3].mxu0 }
 0x29f   : > { %v3401_v53 = vpack.c.bf16 %v692_v51, %v692_v51  ;;  %701 = vrot.lane.b32.xlu0 %v3399_v50, %s2906_s19 }
 0x2a1   : > { %750 = vrot.lane.b32.xlu1 %v3401_v53, %s2906_s19 }
 0x311   : > { %v702_v54 = vpop.permute.xlu0 %701 }
 0x312   : > { %v708_v55 = vsel %vm703_vm3, %v702_v54, 0 }
 0x313   : > { %2240 = vmatpush3.bf16.xpose.msra.mxu1 %v708_v55  ;;  %v751_v56 = vpop.permute.xlu1 %750 }
 0x314   : > { %v756_v57 = vsel %vm703_vm3, %v751_v56, 0  ;;  %2251 = vmatprep.subr.bf16.mxu1 %v2904_v11 }
 0x315   : > { %2246 = vmatpush3.bf16.xpose.msra.mxu0 %v756_v57 }
 0x316   : > { %2257 = vmatprep.subr.bf16.mxu0 %v2904_v11 }
 0x31a   : > { %2242 = vmatmul.mubr.msk.bf16.vlgmr.msra.gmra.mrb[0].mxu1 %vm703_vm3, %v3399_v50 }
 0x31b   : > { %2253 = vmatprep.mubr.msk.bf16.mxu1 %vm2905_vm2, %v2904_v11 }
 0x31c   : > { %2248 = vmatmul.mubr.msk.bf16.vlgmr.msra.gmra.mrb[4].mxu0 %vm703_vm3, %v3401_v53 }
 0x31d   : > { %2259 = vmatprep.mubr.msk.bf16.mxu0 %vm2905_vm2, %v2904_v11 }
 0x3ed   : > { %v744_v58 = vpop.f32.mrb[0].mxu1 }
 0x3ee   : > { %v2243_v59 = vpop.f32.mrb[1].mxu1  ;;  %v798_v60 = vsel %vm703_vm3, %v744_v58, -inf }
 0x3ef   : > { %v747_v61 = vpop.f32.mrb[2].mxu1  ;;  %799 = vmax.xlane.f32.xlu1 %v798_v60  ;;  %v792_v62 = vpop.f32.mrb[4].mxu0 }
 0x3f0   : > { %v2244_v63 = vpop.f32.mrb[3].mxu1  ;;  %v2249_v0 = vpop.f32.mrb[5].mxu0  ;;  %v801_v1 = vsel %vm703_vm3, %v792_v62, -inf }
 0x3f1   : > { %802 = vmax.xlane.f32.xlu0 %v801_v1  ;;  %v795_v4 = vpop.f32.mrb[6].mxu0 }
 0x3f2   : > { %v2250_v5 = vpop.f32.mrb[7].mxu0 }
 0x400   : > { %871 = vrot.lane.b32.xlu1 %v3401_v53, %s2907_s10 }
 0x404   : > { %921 = vrot.lane.b32.xlu1 %v3399_v50, %s2908_s20 }
 0x47c   : > { %v800_v6 = vpop.xlane.xlu1 %799 }
 0x47d   : > { %v804_v7 = vsub.f32 %v744_v58, %v800_v6 }
 0x47e   : > { %v803_v8 = vpop.xlane.xlu0 %802 }
 0x47f   : > { %v806_v9 = vmul.f32 1.442695, %v804_v7  ;;  %v805_v10 = vsub.f32 %v792_v62, %v803_v8 }
 0x480   : > { %v872_v12 = vpop.permute.xlu1 %871 }
 0x481   : > { %2516 = vpow2.f32 %v806_v9  ;;  %v808_v13 = vmul.f32 1.442695, %v805_v10  ;;  %v877_v14 = vsel %vm827_vm4, %v872_v12, 0 }
 0x482   : > { %2258 = vmatpush3.bf16.msra.mxu0 %v877_v14 }
 0x483   : > { %2518 = vpow2.f32 %v808_v13  ;;  %2269 = vmatprep.subr.bf16.mxu0 %v2904_v11 }
 0x484   : > { %v922_v19 = vpop.permute.xlu1 %921 }
 0x485   : > { %v927_v32 = vsel %vm703_vm3, %v922_v19, 0 }
 0x48b   : > { %v2517_v15 = vpop.eup %2516 }
 0x48c   : > { %v810_v16 = vsel %vm703_vm3, %v2517_v15, 0.0 }
 0x48d   : > { %v2519_v17 = vpop.eup %2518  ;;  %811 = vadd.xlane.f32.xlu0 %v810_v16 }
 0x48e   : > { %v813_v18 = vsel %vm703_vm3, %v2519_v17, 0.0 }
 0x48f   : > { %814 = vadd.xlane.f32.xlu1 %v813_v18 }
 0x4a0   : > { %971 = vrot.lane.b32.xlu1 %v3401_v53, %s2908_s20 }
 0x4a3   : > { %822 = vrot.lane.b32.xlu0 %v3399_v50, %s2907_s10 }
 0x4a4   : > { %969 = vrot.lane.b32.xlu1 %v3401_v53, %s2909_s8 }
 0x4a7   : > { %919 = vrot.lane.b32.xlu0 %v3399_v50, %s2909_s8 }
 0x51a   : > { %v812_v20 = vpop.xlane.xlu0 %811 }
 0x51b   : > { %2520 = vrcp.f32 %v812_v20 }
 0x51c   : > { %v815_v21 = vpop.xlane.xlu1 %814 }
 0x51d   : > { %2522 = vrcp.f32 %v815_v21 }
 0x51e   : > { %v823_v22 = vpop.permute.xlu0 %822 }
 0x51f   : > { %v829_v23 = vsel %vm827_vm4, %v823_v22, 0 }
 0x520   : > { %2252 = vmatpush3.bf16.msra.mxu1 %v829_v23  ;;  %v972_v31 = vpop.permute.xlu1 %971 }
 0x521   : > { %2263 = vmatprep.subr.bf16.mxu1 %v2904_v11  ;;  %v977_v34 = vsel %vm703_vm3, %v972_v31, 0 }
 0x522   : > { %v920_v35 = vpop.permute.xlu0 %919 }
 0x524   : > { %v970_v36 = vpop.permute.xlu1 %969 }
 0x525   : > { %v2521_v24 = vpop.eup %2520 }
 0x526   : > { %v818_v25 = vmul.f32 %v2521_v24, %v2517_v15 }
 0x527   : > { %v2523_v26 = vpop.eup %2522 }
 0x528   : > { %v819_v27 = vmul.f32 %v2523_v26, %v2519_v17  ;;  %v820_v29 = vpack.c.bf16 %v818_v25, %v818_v25 }
 0x52a   : > { %2254 = vmatmul.mubr.msk.bf16.vlgmr.msra.gmra.mrb[4].mxu1 %vm703_vm3, %v820_v29  ;;  %v821_v33 = vpack.c.bf16 %v819_v27, %v819_v27 }
 0x52b   : > { %2264 = vmatpush3.bf16.xpose.msra.mxu1 %v927_v32  ;;  %2265 = vmatprep.mubr.msk.bf16.mxu1 %vm2905_vm2, %v2904_v11 }
 0x52c   : > { %2260 = vmatmul.mubr.msk.bf16.vlgmr.msra.gmra.mrb[8].mxu0 %vm703_vm3, %v821_v33  ;;  %2275 = vmatprep.subr.bf16.mxu1 %v2904_v11 }
 0x52d   : > { %2270 = vmatpush3.bf16.xpose.msra.mxu0 %v977_v34  ;;  %2271 = vmatprep.mubr.msk.bf16.mxu0 %vm2905_vm2, %v2904_v11 }
 0x52e   : > { %2281 = vmatprep.subr.bf16.mxu0 %v2904_v11 }
 0x532   : > { %2266 = vmatmul.mubr.msk.bf16.vlgmr.msra.gmra.mrb[8].mxu1 %vm703_vm3, %v920_v35 }
 0x533   : > { %2277 = vmatprep.mubr.msk.bf16.mxu1 %vm2905_vm2, %v2904_v11 }
 0x534   : > { %2272 = vmatmul.mubr.msk.bf16.vlgmr.msra.gmra.mrb[12].mxu0 %vm703_vm3, %v970_v36 }
 0x535   : > { %2283 = vmatprep.mubr.msk.bf16.mxu0 %vm2905_vm2, %v2904_v11 }
 0x5fd   : > { %v3447_v37 = vpop.f32.mrb[4].mxu1 }
 0x5fe   : > { %v2255_v38 = vpop.f32.mrb[5].mxu1 }
 0x5ff   : > { %v868_v39 = vpop.f32.mrb[6].mxu1  ;;  %v3449_v40 = vpop.f32.mrb[8].mxu0 }
 0x600   : > { %v2256_v41 = vpop.f32.mrb[7].mxu1  ;;  %v2261_v42 = vpop.f32.mrb[9].mxu0 }
 0x601   : > { %v916_v43 = vpop.f32.mrb[10].mxu0 }
 0x602   : > { %v2262_v44 = vpop.f32.mrb[11].mxu0 }
 0x605   : > { %v963_v45 = vpop.f32.mrb[8].mxu1 }
 0x606   : > { %v2267_v46 = vpop.f32.mrb[9].mxu1  ;;  %v1019_v47 = vsel %vm703_vm3, %v963_v45, -inf }
 0x607   : > { %1020 = vmax.xlane.f32.xlu0 %v1019_v47  ;;  %v966_v48 = vpop.f32.mrb[10].mxu1  ;;  %v1013_v49 = vpop.f32.mrb[12].mxu0 }
 0x608   : > { %v2268_v51 = vpop.f32.mrb[11].mxu1  ;;  %v2273_v52 = vpop.f32.mrb[13].mxu0  ;;  %v1022_v54 = vsel %vm703_vm3, %v1013_v49, -inf }
 0x609   : > { %1023 = vmax.xlane.f32.xlu1 %v1022_v54  ;;  %v1016_v55 = vpop.f32.mrb[14].mxu0 }
 0x60a   : > { %v2274_v56 = vpop.f32.mrb[15].mxu0 }
 0x61a   : > { %1091 = vrot.lane.b32.xlu1 %v3401_v53, %s2910_s3 }
 0x61e   : > { %1141 = vrot.lane.b32.xlu1 %v3399_v50, %s2911_s18 }
 0x622   : > { %1191 = vrot.lane.b32.xlu1 %v3401_v53, %s2911_s18 }
 0x626   : > { %1189 = vrot.lane.b32.xlu1 %v3401_v53, %s2912_s22 }
 0x694   : > { %v1021_v57 = vpop.xlane.xlu0 %1020 }
 0x695   : > { %v1025_v58 = vsub.f32 %v963_v45, %v1021_v57 }
 0x696   : > { %v1024_v59 = vpop.xlane.xlu1 %1023 }
 0x697   : > { %v1027_v60 = vmul.f32 1.442695, %v1025_v58  ;;  %v1026_v61 = vsub.f32 %v1013_v49, %v1024_v59 }
 0x699   : > { %2524 = vpow2.f32 %v1027_v60  ;;  %v1029_v62 = vmul.f32 1.442695, %v1026_v61 }
 0x69a   : > { %v1092_v63 = vpop.permute.xlu1 %1091 }
 0x69b   : > { %2526 = vpow2.f32 %v1029_v62  ;;  %v1097_v0 = vsel %vm827_vm4, %v1092_v63, 0 }
 0x69c   : > { %2282 = vmatpush3.bf16.msra.mxu0 %v1097_v0 }
 0x69d   : > { %2293 = vmatprep.subr.bf16.mxu0 %v2904_v11 }
 0x69e   : > { %v1142_v13 = vpop.permute.xlu1 %1141 }
 0x69f   : > { %v1147_v19 = vsel %vm703_vm3, %v1142_v13, 0 }
 0x6a2   : > { %v1192_v18 = vpop.permute.xlu1 %1191 }
 0x6a3   : > { %v2525_v1 = vpop.eup %2524  ;;  %v1197_v21 = vsel %vm703_vm3, %v1192_v18, 0 }
 0x6a4   : > { %v1031_v4 = vsel %vm703_vm3, %v2525_v1, 0.0 }
 0x6a5   : > { %v2527_v5 = vpop.eup %2526  ;;  %1032 = vadd.xlane.f32.xlu0 %v1031_v4 }
 0x6a6   : > { %v1034_v6 = vsel %vm703_vm3, %v2527_v5, 0.0  ;;  %v1190_v23 = vpop.permute.xlu1 %1189 }
 0x6a9   : > { %1035 = vadd.xlane.f32.xlu0 %v1034_v6 }
 0x6bf   : > { %1043 = vrot.lane.b32.xlu0 %v3399_v50, %s2910_s3 }
 0x6c3   : > { %1139 = vrot.lane.b32.xlu0 %v3399_v50, %s2912_s22 }
 0x732   : > { %v1033_v7 = vpop.xlane.xlu0 %1032 }
 0x733   : > { %2528 = vrcp.f32 %v1033_v7 }
 0x736   : > { %v1036_v8 = vpop.xlane.xlu0 %1035 }
 0x737   : > { %2530 = vrcp.f32 %v1036_v8 }
 0x73a   : > { %v1044_v9 = vpop.permute.xlu0 %1043 }
 0x73b   : > { %v1049_v10 = vsel %vm827_vm4, %v1044_v9, 0 }
 0x73c   : > { %2276 = vmatpush3.bf16.msra.mxu1 %v1049_v10 }
 0x73d   : > { %v2529_v12 = vpop.eup %2528  ;;  %2287 = vmatprep.subr.bf16.mxu1 %v2904_v11 }
 0x73e   : > { %v1039_v14 = vmul.f32 %v2529_v12, %v2525_v1  ;;  %v1140_v22 = vpop.permute.xlu0 %1139 }
 0x740   : > { %v1041_v15 = vpack.c.bf16 %v1039_v14, %v1039_v14 }
 0x741   : > { %v2531_v16 = vpop.eup %2530 }
 0x742   : > { %v1040_v17 = vmul.f32 %v2531_v16, %v2527_v5  ;;  %2278 = vmatmul.mubr.msk.bf16.vlgmr.msra.gmra.mrb[12].mxu1 %vm703_vm3, %v1041_v15 }
 0x743   : > { %2289 = vmatprep.mubr.msk.bf16.mxu1 %vm2905_vm2, %v2904_v11 }
 0x744   : > { %v1042_v20 = vpack.c.bf16 %v1040_v17, %v1040_v17 }
 0x745   : > { %2288 = vmatpush3.bf16.xpose.msra.mxu1 %v1147_v19 }
 0x746   : > { %2284 = vmatmul.mubr.msk.bf16.vlgmr.msra.gmra.mrb[16].mxu0 %vm703_vm3, %v1042_v20  ;;  %2299 = vmatprep.subr.bf16.mxu1 %v2904_v11 }
 0x747   : > { %2294 = vmatpush3.bf16.xpose.msra.mxu0 %v1197_v21  ;;  %2295 = vmatprep.mubr.msk.bf16.mxu0 %vm2905_vm2, %v2904_v11 }
 0x748   : > { %2305 = vmatprep.subr.bf16.mxu0 %v2904_v11 }
 0x74c   : > { %2290 = vmatmul.mubr.msk.bf16.vlgmr.msra.gmra.mrb[16].mxu1 %vm703_vm3, %v1140_v22 }
 0x74d   : > { %2301 = vmatprep.mubr.msk.bf16.mxu1 %vm2905_vm2, %v2904_v11 }
 0x74e   : > { %2296 = vmatmul.mubr.msk.bf16.vlgmr.msra.gmra.mrb[20].mxu0 %vm703_vm3, %v1190_v23 }
 0x74f   : > { %2307 = vmatprep.mubr.msk.bf16.mxu0 %vm2905_vm2, %v2904_v11 }
 0x815   : > { %v3481_v24 = vpop.f32.mrb[12].mxu1 }
 0x816   : > { %v2279_v25 = vpop.f32.mrb[13].mxu1 }
 0x817   : > { %v1088_v26 = vpop.f32.mrb[14].mxu1 }
 0x818   : > { %v2280_v27 = vpop.f32.mrb[15].mxu1 }
 0x819   : > { %v3483_v29 = vpop.f32.mrb[16].mxu0 }
 0x81a   : > { %v2487_v31 = vpack.i.bf16 %v3483_v29, %v3481_v24  ;;  %v2285_v32 = vpop.f32.mrb[17].mxu0 }
 0x81b   : > { %v1136_v33 = vpop.f32.mrb[18].mxu0 }
 0x81c   : > { %v2286_v34 = vpop.f32.mrb[19].mxu0 }
 0x81f   : > { %v1183_v35 = vpop.f32.mrb[16].mxu1 }
 0x820   : > { %v2291_v36 = vpop.f32.mrb[17].mxu1  ;;  %v1239_v38 = vsel %vm703_vm3, %v1183_v35, -inf }
 0x821   : > { %1240 = vmax.xlane.f32.xlu0 %v1239_v38  ;;  %v1186_v39 = vpop.f32.mrb[18].mxu1  ;;  %v1233_v41 = vpop.f32.mrb[20].mxu0 }
 0x822   : > { %v2292_v42 = vpop.f32.mrb[19].mxu1  ;;  %v2297_v43 = vpop.f32.mrb[21].mxu0  ;;  %v1242_v44 = vsel %vm703_vm3, %v1233_v41, -inf }
 0x823   : > { %1243 = vmax.xlane.f32.xlu1 %v1242_v44  ;;  %v1236_v45 = vpop.f32.mrb[22].mxu0 }
 0x824   : > { %v2298_v46 = vpop.f32.mrb[23].mxu0 }
 0x834   : > { %1311 = vrot.lane.b32.xlu1 %v3401_v53, %s2913_s15 }
 0x838   : > { %1361 = vrot.lane.b32.xlu1 %v3399_v50, %s2914_s27 }
 0x83c   : > { %1411 = vrot.lane.b32.xlu1 %v3401_v53, %s2914_s27 }
 0x840   : > { %1409 = vrot.lane.b32.xlu1 %v3401_v53, %s2915_s5 }
 0x8ae   : > { %v1241_v47 = vpop.xlane.xlu0 %1240 }
 0x8af   : > { %v1245_v48 = vsub.f32 %v1183_v35, %v1241_v47 }
 0x8b0   : > { %v1244_v49 = vpop.xlane.xlu1 %1243 }
 0x8b1   : > { %v1247_v51 = vmul.f32 1.442695, %v1245_v48  ;;  %v1246_v52 = vsub.f32 %v1233_v41, %v1244_v49 }
 0x8b3   : > { %2532 = vpow2.f32 %v1247_v51  ;;  %v1249_v54 = vmul.f32 1.442695, %v1246_v52 }
 0x8b4   : > { %v1312_v55 = vpop.permute.xlu1 %1311 }
 0x8b5   : > { %2534 = vpow2.f32 %v1249_v54  ;;  %v1317_v56 = vsel %vm827_vm4, %v1312_v55, 0 }
 0x8b6   : > { %2306 = vmatpush3.bf16.msra.mxu0 %v1317_v56 }
 0x8b7   : > { %2317 = vmatprep.subr.bf16.mxu0 %v2904_v11 }
 0x8b8   : > { %v1362_v4 = vpop.permute.xlu1 %1361 }
 0x8b9   : > { %v1367_v10 = vsel %vm703_vm3, %v1362_v4, 0 }
 0x8bc   : > { %v1412_v9 = vpop.permute.xlu1 %1411 }
 0x8bd   : > { %v2533_v57 = vpop.eup %2532  ;;  %v1417_v13 = vsel %vm703_vm3, %v1412_v9, 0 }
 0x8be   : > { %v1251_v58 = vsel %vm703_vm3, %v2533_v57, 0.0 }
 0x8bf   : > { %v2535_v59 = vpop.eup %2534  ;;  %1252 = vadd.xlane.f32.xlu0 %v1251_v58 }
 0x8c0   : > { %v1254_v60 = vsel %vm703_vm3, %v2535_v59, 0.0  ;;  %v1410_v15 = vpop.permute.xlu1 %1409 }
 0x8c3   : > { %1255 = vadd.xlane.f32.xlu0 %v1254_v60 }
 0x8d9   : > { %1263 = vrot.lane.b32.xlu0 %v3399_v50, %s2913_s15 }
 0x8dd   : > { %1359 = vrot.lane.b32.xlu0 %v3399_v50, %s2915_s5 }
 0x94c   : > { %v1253_v61 = vpop.xlane.xlu0 %1252 }
 0x94d   : > { %2536 = vrcp.f32 %v1253_v61  ;;  %v2504_v61 = vld [vmem:[%s494_s24] sm:$0xff]  }
 0x950   : > { %v1256_v62 = vpop.xlane.xlu0 %1255 }
 0x951   : > { %2538 = vrcp.f32 %v1256_v62  ;;  %v2505_v62 = vld [vmem:[%s494_s24 + $0x8] sm:$0xff]  }
 0x954   : > { %v1264_v63 = vpop.permute.xlu0 %1263 }
 0x955   : > { %v1269_v0 = vsel %vm827_vm4, %v1264_v63, 0 }
 0x956   : > { %2300 = vmatpush3.bf16.msra.mxu1 %v1269_v0 }
 0x957   : > { %v2537_v1 = vpop.eup %2536  ;;  %2311 = vmatprep.subr.bf16.mxu1 %v2904_v11 }
 0x958   : > { %v1259_v5 = vmul.f32 %v2537_v1, %v2533_v57  ;;  %v1360_v14 = vpop.permute.xlu0 %1359 }
 0x95a   : > { %v1261_v6 = vpack.c.bf16 %v1259_v5, %v1259_v5 }
 0x95b   : > { %v2539_v7 = vpop.eup %2538 }
 0x95c   : > { %v1260_v8 = vmul.f32 %v2539_v7, %v2535_v59  ;;  %2302 = vmatmul.mubr.msk.bf16.vlgmr.msra.gmra.mrb[20].mxu1 %vm703_vm3, %v1261_v6 }
 0x95d   : > { %2313 = vmatprep.mubr.msk.bf16.mxu1 %vm2905_vm2, %v2904_v11 }
 0x95e   : > { %v1262_v12 = vpack.c.bf16 %v1260_v8, %v1260_v8 }
 0x95f   : > { %2312 = vmatpush3.bf16.xpose.msra.mxu1 %v1367_v10 }
 0x960   : > { %2308 = vmatmul.mubr.msk.bf16.vlgmr.msra.gmra.mrb[24].mxu0 %vm703_vm3, %v1262_v12  ;;  %2323 = vmatprep.subr.bf16.mxu1 %v2904_v11 }
 0x961   : > { %2318 = vmatpush3.bf16.xpose.msra.mxu0 %v1417_v13  ;;  %2319 = vmatprep.mubr.msk.bf16.mxu0 %vm2905_vm2, %v2904_v11 }
 0x962   : > { %2329 = vmatprep.subr.bf16.mxu0 %v2904_v11 }
 0x966   : > { %2314 = vmatmul.mubr.msk.bf16.vlgmr.msra.gmra.mrb[24].mxu1 %vm703_vm3, %v1360_v14 }
 0x967   : > { %2325 = vmatprep.mubr.msk.bf16.mxu1 %vm2905_vm2, %v2904_v11 }
 0x968   : > { %2320 = vmatmul.mubr.msk.bf16.vlgmr.msra.gmra.mrb[28].mxu0 %vm703_vm3, %v1410_v15 }
 0x969   : > { %2331 = vmatprep.mubr.msk.bf16.mxu0 %vm2905_vm2, %v2904_v11 }
 0xa2f   : > { %v1305_v16 = vpop.f32.mrb[20].mxu1 }
 0xa30   : > { %v2303_v17 = vpop.f32.mrb[21].mxu1 }
 0xa31   : > { %v1308_v18 = vpop.f32.mrb[22].mxu1 }
 0xa32   : > { %v2304_v19 = vpop.f32.mrb[23].mxu1 }
 0xa33   : > { %v1353_v20 = vpop.f32.mrb[24].mxu0 }
 0xa34   : > { %v2492_v21 = vpack.i.bf16 %v1353_v20, %v1305_v16  ;;  %v2309_v22 = vpop.f32.mrb[25].mxu0 }
 0xa35   : > { %v1356_v23 = vpop.f32.mrb[26].mxu0 }
 0xa36   : > { %v2310_v25 = vpop.f32.mrb[27].mxu0 }
 0xa39   : > { %v1403_v26 = vpop.f32.mrb[24].mxu1 }
 0xa3a   : > { %v2315_v27 = vpop.f32.mrb[25].mxu1  ;;  %v1459_v32 = vsel %vm703_vm3, %v1403_v26, -inf }
 0xa3b   : > { %1460 = vmax.xlane.f32.xlu0 %v1459_v32  ;;  %v1406_v33 = vpop.f32.mrb[26].mxu1  ;;  %v1453_v34 = vpop.f32.mrb[28].mxu0  ;;  %v1618_v32 = vsub.s32 2, %v3383_v28 }
 0xa3c   : > { %v2316_v35 = vpop.f32.mrb[27].mxu1  ;;  %v2321_v36 = vpop.f32.mrb[29].mxu0  ;;  %v1462_v38 = vsel %vm703_vm3, %v1453_v34, -inf  ;;  %v1678_v33 = vsub.s32 3, %v3383_v28 }
 0xa3d   : > { %1463 = vmax.xlane.f32.xlu1 %v1462_v38  ;;  %v1456_v39 = vpop.f32.mrb[30].mxu0 }
 0xa3e   : > { %v2322_v41 = vpop.f32.mrb[31].mxu0 }
 0xa4e   : > { %1531 = vrot.lane.b32.xlu1 %v3401_v53, %s2916_s11 }
 0xa52   : > { %2488 = vrot.lane.b32.xlu1 %v2487_v31, %s2917_s29 }
 0xa56   : > { %2493 = vrot.lane.b32.xlu1 %v2492_v21, %s2918_s25 }
 0xac8   : > { %v1461_v42 = vpop.xlane.xlu0 %1460 }
 0xac9   : > { %v1465_v43 = vsub.f32 %v1403_v26, %v1461_v42 }
 0xaca   : > { %v1464_v44 = vpop.xlane.xlu1 %1463 }
 0xacb   : > { %v1467_v45 = vmul.f32 1.442695, %v1465_v43  ;;  %v1466_v46 = vsub.f32 %v1453_v34, %v1464_v44 }
 0xacd   : > { %2540 = vpow2.f32 %v1467_v45  ;;  %v1469_v47 = vmul.f32 1.442695, %v1466_v46 }
 0xace   : > { %v1532_v48 = vpop.permute.xlu1 %1531 }
 0xacf   : > { %2542 = vpow2.f32 %v1469_v47  ;;  %v1537_v49 = vsel %vm827_vm4, %v1532_v48, 0 }
 0xad0   : > { %2330 = vmatpush3.bf16.msra.mxu0 %v1537_v49 }
 0xad1   : > { %2343 = vmatprep.subr.bf16.mxu0 %v2904_v11 }
 0xad2   : > { %v2489_v10 = vpop.permute.xlu1 %2488 }
 0xad3   : > { %v2491_v13 = vunpack.i.h.bf16 %v2489_v10  ;;  %v2490_v14 = vunpack.i.l.bf16 %v2489_v10 }
 0xad5   : > { %v1604_v18 = vsel %vm703_vm3, %v3449_v40, %v2491_v13  ;;  %v1603_v19 = vsel %vm703_vm3, %v3447_v37, %v2490_v14  ;;  %v1619_v40 = vrot.slane %v3387_v30, %v1618_v32  ;;  %v1679_v37 = vrot.slane %v3387_v30, %v1678_v33 }
 0xad6   : > { %v2494_v12 = vpop.permute.xlu1 %2493 }
 0xad7   : > { %v2541_v53 = vpop.eup %2540  ;;  %v2496_v15 = vunpack.i.h.bf16 %v2494_v12  ;;  %v2495_v16 = vunpack.i.l.bf16 %v2494_v12 }
 0xad8   : > { %v1471_v24 = vsel %vm703_vm3, %v2541_v53, 0.0 }
 0xad9   : > { %v2543_v29 = vpop.eup %2542  ;;  %1472 = vadd.xlane.f32.xlu0 %v1471_v24  ;;  %v1606_v22 = vsel %vm1605_vm5, %v1603_v19, %v2495_v16  ;;  %v1607_v23 = vsel %vm1605_vm5, %v1604_v18, %v2496_v15  ;;  %v2507_v24 = vld [vmem:[%s503_s1 + $0x8] sm:$0xff]   ;;  %v2510_v19 = vld [vmem:[%s3350_s21 + $0x10] sm:$0xff]  }
 0xada   : > { %v1474_v31 = vsel %vm703_vm3, %v2543_v29, 0.0  ;;  %v2509_v18 = vld [vmem:[%s3350_s21 + $0x8] sm:$0xff]  }
 0xadd   : > { %1475 = vadd.xlane.f32.xlu0 %v1474_v31 }
 0xaf3   : > { %1483 = vrot.lane.b32.xlu0 %v3399_v50, %s2916_s11 }
 0xb66   : > { %v1473_v51 = vpop.xlane.xlu0 %1472 }
 0xb67   : > { %2544 = vrcp.f32 %v1473_v51 }
 0xb6a   : > { %v1476_v52 = vpop.xlane.xlu0 %1475 }
 0xb6b   : > { %2546 = vrcp.f32 %v1476_v52 }
 0xb6e   : > { %v1484_v54 = vpop.permute.xlu0 %1483 }
 0xb6f   : > { %v1489_v55 = vsel %vm827_vm4, %v1484_v54, 0 }
 0xb70   : > { %2324 = vmatpush3.bf16.msra.mxu1 %v1489_v55 }
 0xb71   : > { %v2545_v56 = vpop.eup %2544  ;;  %2335 = vmatprep.subr.bf16.mxu1 %v2904_v11 }
 0xb72   : > { %v1479_v57 = vmul.f32 %v2545_v56, %v2541_v53  ;;  %v2506_v53 = vld [vmem:[%s503_s1] sm:$0xff]  }
 0xb74   : > { %v1481_v58 = vpack.c.bf16 %v1479_v57, %v1479_v57 }
 0xb75   : > { %v2547_v59 = vpop.eup %2546 }
 0xb76   : > { %v1480_v60 = vmul.f32 %v2547_v59, %v2543_v29  ;;  %2326 = vmatmul.mubr.msk.bf16.vlgmr.msra.gmra.mrb[28].mxu1 %vm703_vm3, %v1481_v58 }
 0xb77   : > { %2339 = vmatprep.mubr.msk.bf16.mxu1 %vm2905_vm2, %v2904_v11  ;;  %2336 = vmatpush3.bf16.msra.mxu1 %v2504_v61 }
 0xb78   : > { %v1482_v50 = vpack.c.bf16 %v1480_v60, %v1480_v60  ;;  %2337 = vmatprep.subr.bf16.mxu1 %v2904_v11 }
 0xb7a   : > { %2332 = vmatmul.mubr.msk.bf16.vlgmr.msra.gmra.mrb[32].mxu0 %vm703_vm3, %v1482_v50 }
 0xb7b   : > { %2347 = vmatprep.mubr.msk.bf16.mxu0 %vm2905_vm2, %v2904_v11  ;;  %2338 = vmatpush3.bf16.msra.mxu1 %v2505_v62 }
 0xb7c   : > { %2351 = vmatprep.subr.bf16.mxu1 %v2904_v11  ;;  %2344 = vmatpush3.bf16.msra.mxu0 %v2506_v53 }
 0xb7d   : > { %2345 = vmatprep.subr.bf16.mxu0 %v2904_v11 }
 0xb80   : > { %2346 = vmatpush3.bf16.msra.mxu0 %v2507_v24 }
 0xc49   : > { %v1525_v63 = vpop.f32.mrb[28].mxu1 }
 0xc4a   : > { %v2327_v0 = vpop.f32.mrb[29].mxu1 }
 0xc4b   : > { %v1528_v1 = vpop.f32.mrb[30].mxu1 }
 0xc4c   : > { %v2328_v4 = vpop.f32.mrb[31].mxu1 }
 0xc4d   : > { %v1573_v5 = vpop.f32.mrb[32].mxu0 }
 0xc4e   : > { %v2497_v6 = vpack.i.bf16 %v1573_v5, %v1525_v63  ;;  %v2333_v7 = vpop.f32.mrb[33].mxu0  ;;  %v1716_v63 = vsub.s32 4, %v3383_v28 }
 0xc4f   : > { %v1576_v8 = vpop.f32.mrb[34].mxu0 }
 0xc50   : > { %2498 = vrot.lane.b32.xlu0 %v2497_v6, %s2919_s14  ;;  %v2334_v9 = vpop.f32.mrb[35].mxu0  ;;  %v1717_v5 = vrot.slane %v3387_v30, %v1716_v63  ;;  %v1722_v6 = vsub.s32 5, %v3383_v28 }
 0xc52   : > { %v1723_v12 = vrot.slane %v3387_v30, %v1722_v6 }
 0xcc2   : > { %v2499_v17 = vpop.permute.xlu0 %2498 }
 0xcc3   : > { %v2501_v20 = vunpack.i.h.bf16 %v2499_v17  ;;  %v2500_v21 = vunpack.i.l.bf16 %v2499_v17  ;;  %v2508_v17 = vld [vmem:[%s3350_s21] sm:$0xff]  }
 0xcc5   : > { %v1610_v25 = vsel %vm1608_vm6, %v1607_v23, %v2501_v20  ;;  %v1609_v26 = vsel %vm1608_vm6, %v1606_v22, %v2500_v21  ;;  %v2511_v20 = vld [vmem:[%s3350_s21 + $0x18] sm:$0xff]   ;;  %v2165_v21 = vld [vmem:[%s476_s17] ss:$0 sm:$0xff] }
 0xcc6   : > { %v1611_v27 = vpack.c.bf16 %v1610_v25, %v1609_v26 }
 0xcc8   : > { %2340 = vmatmul.mubr.msk.bf16.vlgmr.msra.gmra.mrb[32].mxu1 %vm583_vm1, %v1611_v27 }
 0xcc9   : > { %2359 = vmatprep.mubr.msk.bf16.mxu1 %vm2905_vm2, %v2904_v11  ;;  %2352 = vmatpush3.bf16.msra.mxu1 %v2508_v17 }
 0xcca   : > { %2353 = vmatprep.subr.bf16.mxu1 %v2904_v11 }
 0xccd   : > { %2354 = vmatpush3.bf16.msra.mxu1 %v2509_v18 }
 0xcce   : > { %2355 = vmatprep.subr.bf16.mxu1 %v2904_v11 }
 0xcd1   : > { %2356 = vmatpush3.bf16.msra.mxu1 %v2510_v19 }
 0xcd2   : > { %2357 = vmatprep.subr.bf16.mxu1 %v2904_v11 }
 0xcd5   : > { %2358 = vmatpush3.bf16.msra.mxu1 %v2511_v20 }
 0xd9b   : > { %v1669_v34 = vpop.f32.mrb[32].mxu1 }
 0xd9c   : > { %v1670_v35 = vadd.f32 %v1669_v34, %v1619_v40  ;;  %v2341_v36 = vpop.f32.mrb[33].mxu1 }
 0xd9d   : > { %v1672_v38 = vpop.f32.mrb[34].mxu1 }
 0xd9e   : > { %v1680_v39 = vmul.f32 %v1679_v37, %v1670_v35  ;;  %v1673_v41 = vadd.f32 %v1672_v38, %v1619_v40  ;;  %v2342_v42 = vpop.f32.mrb[35].mxu1 }
 0xda0   : > { %v3555_v43 = vadd.f32 %v1680_v39, %v3357_v2  ;;  %v1681_v44 = vmul.f32 %v1679_v37, %v1673_v41 }
 0xda2   : > { %v3558_v45 = vadd.f32 %v1681_v44, %v3359_v3  ;;  %v1684_v46 = vsel %vm583_vm1, %v3555_v43, 0.0  ;;  %v1692_v48 = vmul.f32 %v3555_v43, %v3555_v43  ;;  %v1815_v44 = vsub.s32 6, %v3383_v28 }
 0xda3   : > { %1685 = vadd.xlane.f32.xlu1 %v1684_v46  ;;  %v1888_v46 = vsub.s32 7, %v3383_v28 }
 0xda4   : > { %v1687_v47 = vsel %vm583_vm1, %v3558_v45, 0.0  ;;  %v1694_v49 = vsel %vm583_vm1, %v1692_v48, 0.0  ;;  %v1693_v2 = vmul.f32 %v3558_v45, %v3558_v45 }
 0xda5   : > { %1688 = vadd.xlane.f32.xlu0 %v1687_v47  ;;  %v1816_v47 = vrot.slane %v3387_v30, %v1815_v44  ;;  %v1889_v48 = vrot.slane %v3387_v30, %v1888_v46 }
 0xda6   : > { %v1697_v3 = vsel %vm583_vm1, %v1693_v2, 0.0 }
 0xda9   : > { %1695 = vadd.xlane.f32.xlu0 %v1694_v49 }
 0xdad   : > { %1698 = vadd.xlane.f32.xlu0 %v1697_v3 }
 0xe30   : > { %v1686_v29 = vpop.xlane.xlu1 %1685 }
 0xe31   : > { %v1690_v51 = vmul.f32 0.03125, %v1686_v29 }
 0xe32   : > { %v1689_v31 = vpop.xlane.xlu0 %1688 }
 0xe33   : > { %v1702_v54 = vmul.f32 %v1690_v51, %v1690_v51  ;;  %v1691_v55 = vmul.f32 0.03125, %v1689_v31  ;;  %v1706_v0 = vsub.f32 %v3555_v43, %v1690_v51 }
 0xe35   : > { %v1703_v59 = vmul.f32 %v1691_v55, %v1691_v55  ;;  %v1707_v7 = vsub.f32 %v3558_v45, %v1691_v55 }
 0xe36   : > { %v1696_v52 = vpop.xlane.xlu0 %1695 }
 0xe37   : > { %v1700_v56 = vmul.f32 0.03125, %v1696_v52 }
 0xe39   : > { %v1704_v57 = vsub.f32 %v1700_v56, %v1702_v54 }
 0xe3a   : > { %v1699_v58 = vpop.xlane.xlu0 %1698 }
 0xe3b   : > { %v1708_v60 = vadd.f32 1e-05, %v1704_v57  ;;  %v1701_v50 = vmul.f32 0.03125, %v1699_v58 }
 0xe3d   : > { %2548 = vrsqrt.f32 %v1708_v60  ;;  %v1705_v61 = vsub.f32 %v1701_v50, %v1703_v59 }
 0xe3f   : > { %v1709_v62 = vadd.f32 1e-05, %v1705_v61 }
 0xe41   : > { %2550 = vrsqrt.f32 %v1709_v62 }
 0xe47   : > { %v2549_v1 = vpop.eup %2548 }
 0xe48   : > { %v1712_v4 = vmul.f32 %v2549_v1, %v1706_v0 }
 0xe4a   : > { %v1718_v10 = vmul.f32 %v1717_v5, %v1712_v4 }
 0xe4b   : > { %v2551_v8 = vpop.eup %2550 }
 0xe4c   : > { %v1713_v9 = vmul.f32 %v2551_v8, %v1707_v7  ;;  %v1724_v14 = vadd.f32 %v1723_v12, %v1718_v10 }
 0xe4e   : > { %v1719_v13 = vmul.f32 %v1717_v5, %v1713_v9 }
 0xe50   : > { %v1725_v15 = vadd.f32 %v1723_v12, %v1719_v13 }
 0xe52   : > { %v1726_v16 = vpack.c.bf16 %v1725_v15, %v1724_v14 }
 0xe54   : > { %2348 = vmatmul.mubr.msk.bf16.vlgmr.msra.gmra.mrb[36].mxu0 %vm583_vm1, %v1726_v16 }
 0xf27   : > { %v1787_v22 = vpop.f32.mrb[36].mxu0 }
 0xf28   : > { %v1788_v23 = vadd.f32 %v2165_v21, %v1787_v22  ;;  %v2349_v25 = vpop.f32.mrb[37].mxu0 }
 0xf29   : > { %v1790_v26 = vpop.f32.mrb[38].mxu0 }
 0xf2a   : > { %v1796_v27 = vmul.f32 0.70710677, %v1788_v23  ;;  %v1791_v32 = vadd.f32 %v2165_v21, %v1790_v26  ;;  %v2350_v33 = vpop.f32.mrb[39].mxu0  ;;  %v1794_v36 = vmul.f32 0.5, %v1788_v23 }
 0xf2c   : > { %2552 = verf.f32 %v1796_v27  ;;  %v1797_v40 = vmul.f32 0.70710677, %v1791_v32  ;;  %v1795_v38 = vmul.f32 0.5, %v1791_v32 }
 0xf2e   : > { %2554 = verf.f32 %v1797_v40 }
 0xf36   : > { %v2553_v37 = vpop.eup %2552 }
 0xf37   : > { %v1800_v34 = vadd.f32 1.0, %v2553_v37 }
 0xf38   : > { %v2555_v35 = vpop.eup %2554 }
 0xf39   : > { %v1801_v11 = vadd.f32 1.0, %v2555_v35  ;;  %v1802_v39 = vmul.f32 %v1800_v34, %v1794_v36 }
 0xf3b   : > { %v1803_v41 = vmul.f32 %v1801_v11, %v1795_v38 }
 0xf3d   : > { %v1804_v42 = vpack.c.bf16 %v1803_v41, %v1802_v39 }
 0xf3f   : > { %2360 = vmatmul.mubr.msk.bf16.vlgmr.msra.gmra.mrb[36].mxu1 %vm1841_vm7, %v1804_v42 }
0x1012   : > { %v1879_v49 = vpop.f32.mrb[36].mxu1 }
0x1013   : > { %v1880_v2 = vadd.f32 %v1879_v49, %v1816_v47  ;;  %v2361_v3 = vpop.f32.mrb[37].mxu1 }
0x1014   : > { %v1882_v53 = vpop.f32.mrb[38].mxu1 }
0x1015   : > { %v1890_v24 = vmul.f32 %v1889_v48, %v1880_v2  ;;  %v1883_v29 = vadd.f32 %v1882_v53, %v1816_v47  ;;  %v2362_v31 = vpop.f32.mrb[39].mxu1  ;;  %1899 = sbr.rel (%p2174_p4) target bundleno = 4124 (0x101c), region = 92 }
0x1017   : > { %v1892_v51 = vadd.f32 %v1890_v24, %v3555_v43  ;;  %v1891_v52 = vmul.f32 %v1889_v48, %v1883_v29 }
0x1019   : > { %1894 = vst.msk [vmem:[#allocation2] sm:$0xff] %vm583_vm1, %v1892_v51  ;;  %v1893_v54 = vadd.f32 %v1891_v52, %v3558_v45  ;;  %1900 = vst.msk [vmem:[#allocation17] sm:$0xff] (!%p2174_p4), %vm583_vm1, %v1892_v51 }
0x101b   : > { %1895 = vst.msk [vmem:[#allocation2 + $0x8] sm:$0xff] %vm583_vm1, %v1893_v54  ;;  %1901 = vst.msk [vmem:[#allocation17 + $0x8] sm:$0xff] (!%p2174_p4), %vm583_vm1, %v1893_v54 }
0x101c PF: > { %p2414_p13 = scmp.eq.s32.totalorder %s3140_s16, 1  ;;  %s2920_s17 = smov [#allocation17]  }
0x101d   : > { %s1911_s23 = sshll.u32 %s2920_s17, 4  ;;  %s1912_s23 = int_to_ptr.vmem [resolvable:$true] %s1911_s23 }
0x101e   : > { %s2794_s24 = scalar_lea.vmem %s1912_s23, 256  ;;  %p2801_p11 = scmp.lt.s32.totalorder %s1912_s23, %s1912_s23 }
0x101f   : > { %p2795_p2 = scmp.ne.s32.totalorder %s1912_s23, %s2794_s24  ;;  %p2802_p0 = scmp.lt.s32.totalorder %s2794_s24, %s2794_s24 }
0x1021   : > { %p2796_p12 = pnand %p2795_p2, %p2414_p13  ;;  %p2803_p6 = por %p2802_p0, %p2801_p11 }
0x1023   : > { %p2797_p1 = pneg %p2796_p12 }
0x1025   : > { %p2804_p8 = pnand %p2803_p6, %p2797_p1 }
0x1027   : > { %2807 = shalt.err (!%p2804_p8)
}
0x1028   : > { %s3701_s13 = sld [smem:[#allocation32_spill]] }
0x102e   : > { %s2808_s21 = scalar_lea.hbm %s3701_s13, 256 }
0x102f   : > { %p2809_p3 = scmp.ne.s32.totalorder %s3701_s13, %s2808_s21  ;;  %p2814_p10 = scmp.lt.u32.totalorder %s2808_s21, %s3701_s13 }
0x1031   : > { %p2810_p5 = pnand %p2809_p3, %p2414_p13 }
0x1033   : > { %p2811_p9 = pneg %p2810_p5 }
0x1035   : > { %p2816_p7 = pnand %p2814_p10, %p2811_p9 }
0x1037   : > { %2819 = shalt.err (!%p2816_p7)
}
0x1038   : > { %s2921_s8 = smov 128  }
0x1039   : > { %2382 = dma.vmem_to_hbm [thread:$0]  (%p2414_p13), %s1912_s23, 256, %s3701_s13, [#allocation5], %s2921_s8, %s2921_s8, %s2917_s29  }
0x103a   : > { %2865 = dma.done.wait (%p2414_p13), [#allocation5], 256  }
0x103b   : > { %2867 = vsyncadd (%p2414_p13), [#allocation5], 4294967040 }
0x103c PF: > { %s3702_s22 = sld [smem:[#allocation26_spill]]  ;;  %s3703_s15 = sld [smem:[#allocation24_spill]] }
0x103d   : > { %s3704_s29 = sld [smem:[#allocation28_spill]]  ;;  %s3705_s5 = sld [smem:[#allocation27_spill]] }
0x103e   : > { %s3706_s27 = smov %s2874_s28  ;;  %s3708_s30 = smov %s2886_s9 }
0x1042   : > { %s32_s10 = sadd.s32 1, %s3702_s22   ;;  %s3707_s28 = smov %s3703_s15 }
0x1043   : > { %p29_p4 = scmp.ge.s32.totalorder %s32_s10, 4   ;;  %s3709_s9 = smov %s3705_s5 }
0x1045   :  { %31 = sbr.rel (!%p29_p4) target bundleno = 17 (0x11), region = 176 }
0x104c   :  { %1927 = vsyncpa [#allocation4], 1 }
0x104d   :  { %1929 = vsyncpa [#allocation4 + $0x1], 1 }
0x104e   :  { %1930 = vsyncpa [#allocation7], 1 }
0x104f   :  { %1932 = vsyncpa [#allocation7 + $0x1], 1 }
0x1050   :  { %1933 = vsyncpa [#allocation10], 1 }
0x1051   :  { %1935 = vsyncpa [#allocation10 + $0x1], 1 }
0x1052   :  { %1936 = vsyncpa [#allocation13], 1 }
0x1053   :  { %1938 = vsyncpa [#allocation13 + $0x1], 1 }
0x1054   :  { %1939 = vsyncpa [#allocation16], 1 }
0x1055   :  { %1941 = vsyncpa [#allocation16 + $0x1], 1 }
0x1056   :  { %1942 = vsyncpa [#allocation5], 1 }
0x1057   :  { %1944 = vsyncpa [#allocation5 + $0x1], 1 }

</bundles_post_ra>
